<compile_context>
chip_gen: v7x
topology: tpu7x:2x2x1
jax: 0.10.0
libtpu: 0.0.40
codegen_flags: <defaults>
</compile_context>

<pallas_src>
import numpy as np

import jax
import jax.numpy as jnp
from jax import lax
from jax.experimental import pallas as pl
from jax.experimental.pallas import tpu as pltpu


# ----------------------- static operator construction -----------------------

def _interp_matrix(out_len: int, in_len: int) -> np.ndarray:
    """(out_len, in_len) align_corners=True linear interpolation matrix."""
    A = np.zeros((out_len, in_len), np.float32)
    if out_len == 1:
        src = np.zeros((1,), np.float64)
    else:
        src = np.arange(out_len, dtype=np.float64) * (in_len - 1) / (out_len - 1)
    lo = np.clip(np.floor(src).astype(np.int64), 0, in_len - 1)
    hi = np.clip(lo + 1, 0, in_len - 1)
    frac = (src - lo).astype(np.float32)
    for i in range(out_len):
        A[i, lo[i]] += 1.0 - frac[i]
        A[i, hi[i]] += frac[i]
    return A


def _upsample_matrix_t(h: int, w: int, H: int, W: int) -> np.ndarray:
    """(h*w, H*W): right-multiplying a (C, h*w) map bilinearly upsamples it
    (nn.UpsamplingBilinear2d semantics, align_corners=True)."""
    U = np.kron(_interp_matrix(H, h), _interp_matrix(W, w))   # (H*W, h*w)
    return np.ascontiguousarray(U.T).astype(np.float32)


def _pack_w3x3_flat(w):
    """(Cout, Cin, 3, 3) -> (Cout, 9*Cin).

    Column index is t*Cin + i with t = (dy+1)*3 + (dx+1), matching the row
    order of the stacked shifted taps built inside the kernel.
    """
    cout, cin = w.shape[0], w.shape[1]
    return jnp.transpose(w, (0, 2, 3, 1)).reshape(cout, 9 * cin)


# ------------------------------ Pallas kernels -------------------------------

def _make_level_kernel(W: int, has_topdown: bool, emit_f: bool):
    """One image of one pyramid level, fully fused:
         f = wlat @ x [+ g @ ut]                  (1x1 lateral + top-down add)
         p = wout @ stack_t(shift_t(f) * mask_t)  (3x3 output conv, pad=1)
    The 9 taps are shifted copies of f written into a (9*Cf, HW) VMEM scratch
    (flat shift s = dy*W + dx; zero-init supplies the top/bottom padding and
    an iota column mask kills the row-wrap of the +-1 column shifts).
    """

    def kernel(*refs):
        it = iter(refs)
        x_ref = next(it)
        g_ref = next(it) if has_topdown else None
        ut_ref = next(it) if has_topdown else None
        wlat_ref = next(it)
        wout_ref = next(it)
        p_ref = next(it)
        f_ref = next(it) if emit_f else None
        taps_ref = next(it)

        # Lateral 1x1 conv (+ upsampled top-down add); bf16 MXU, f32 accum.
        f = jnp.dot(wlat_ref[...], x_ref[0], preferred_element_type=jnp.float32)
        if has_topdown:
            # TODO(synk): dense (hw, HW) upsample operator; make separable at
            # production resolutions.
            f = f + jnp.dot(g_ref[0], ut_ref[...],
                            preferred_element_type=jnp.float32)
        if emit_f:
            f_ref[0] = f.astype(f_ref.dtype)          # bf16 inter-level handoff

        fb = f.astype(jnp.bfloat16)
        Cf, HW = fb.shape

        # Column coordinate of every flattened spatial position (VPU only).
        col = lax.broadcasted_iota(jnp.int32, (Cf, HW), 1) % W
        zero = jnp.zeros_like(fb)
        # Pre-mask the *input* columns that only wrapped (invalid) outputs
        # would read:  dx=-1 taps read input col W-1 only via row wrap,
        #              dx=+1 taps read input col 0   only via row wrap.
        fb_dx = {
            -1: jnp.where(col == W - 1, zero, fb),
            0: fb,
            1: jnp.where(col == 0, zero, fb),
        }

        # Build the (9*Cf, HW) im2col block in VMEM from 9 shifted copies.
        taps_ref[...] = jnp.zeros_like(taps_ref)
        t = 0
        for dy in (-1, 0, 1):
            for dx in (-1, 0, 1):
                src = fb_dx[dx]
                s = dy * W + dx                 # tap[m] = f_flat[m + s]
                lo, hi = t * Cf, (t + 1) * Cf
                if s >= 0:
                    taps_ref[lo:hi, 0:HW - s] = src[:, s:HW]
                else:
                    taps_ref[lo:hi, -s:HW] = src[:, 0:HW + s]
                t += 1

        # 3x3 output conv as ONE K = 9*Cf matmul: (Cf, 9*Cf) @ (9*Cf, HW).
        p_ref[0] = jnp.dot(wout_ref[...], taps_ref[...],
                           preferred_element_type=jnp.float32
                           ).astype(p_ref.dtype)

    return kernel


# ------------------------------ level wrappers -------------------------------

def _run_level(x, g, ut, wlat, wout, W, *, emit_f):
    """x: (N, Cin, HW) bf16; g: (N, Cf, hw) bf16 or None; ut: (hw, HW) bf16.

    Returns (p_f32, f_bf16) if emit_f else p_f32.
    """
    N, Cin, HW = x.shape
    Cf = wlat.shape[0]
    has_topdown = g is not None

    inputs = [x]
    in_specs = [pl.BlockSpec((1, Cin, HW), lambda n: (n, 0, 0))]
    flops = 2 * Cf * Cin * HW
    if has_topdown:
        hw = g.shape[2]
        inputs += [g, ut]
        in_specs += [pl.BlockSpec((1, Cf, hw), lambda n: (n, 0, 0)),
                     pl.BlockSpec((hw, HW), lambda n: (0, 0))]
        flops += 2 * Cf * hw * HW
    inputs += [wlat, wout]
    in_specs += [pl.BlockSpec((Cf, Cin), lambda n: (0, 0)),
                 pl.BlockSpec((Cf, 9 * Cf), lambda n: (0, 0))]
    flops += 2 * (9 * Cf) * Cf * HW
    flops *= N

    if emit_f:
        out_shape = (jax.ShapeDtypeStruct((N, Cf, HW), jnp.float32),
                     jax.ShapeDtypeStruct((N, Cf, HW), jnp.bfloat16))
        out_specs = (pl.BlockSpec((1, Cf, HW), lambda n: (n, 0, 0)),
                     pl.BlockSpec((1, Cf, HW), lambda n: (n, 0, 0)))
    else:
        out_shape = jax.ShapeDtypeStruct((N, Cf, HW), jnp.float32)
        out_specs = pl.BlockSpec((1, Cf, HW), lambda n: (n, 0, 0))

    # VMEM estimate: double-buffered input/output blocks + 1x tap scratch.
    in_block_bytes = 2 * (Cin * HW + Cf * Cin + 9 * Cf * Cf)
    if has_topdown:
        in_block_bytes += 2 * (Cf * hw + hw * HW)
    out_block_bytes = 4 * Cf * HW + (2 * Cf * HW if emit_f else 0)
    vmem_est = 2 * (in_block_bytes + out_block_bytes) + 2 * 9 * Cf * HW
    assert vmem_est < 16 * 1024 * 1024, (
        "per-level VMEM blocks too large (%d bytes); "
        "TODO(synk): halo-tiled spatial grid for production resolutions"
        % vmem_est)

    bytes_accessed = int(
        sum(int(np.prod(a.shape)) * a.dtype.itemsize for a in inputs)
        + 4 * N * Cf * HW + (2 * N * Cf * HW if emit_f else 0))

    return pl.pallas_call(
        _make_level_kernel(W, has_topdown, emit_f),
        out_shape=out_shape,
        grid=(N,),
        in_specs=in_specs,
        out_specs=out_specs,
        scratch_shapes=[pltpu.VMEM((9 * Cf, HW), jnp.bfloat16)],
        compiler_params=pltpu.CompilerParams(
            dimension_semantics=("parallel",),
            vmem_limit_bytes=int(max(16 * 1024 * 1024, 4 * vmem_est))),
        cost_estimate=pl.CostEstimate(
            flops=int(flops), transcendentals=0,
            bytes_accessed=bytes_accessed),
    )(*inputs)


# --------------------------------- FPN ---------------------------------------

def init_fpn_params(key, c2, c3, c4, c5, inner_channel=32):
    # nn.Conv2d(..., bias=False) is the spec module's default -> no biases.
    ks = jax.random.split(key, 8)
    scale = 0.05

    def conv_w(k, cout, cin, ksz):
        return (scale * jax.random.normal(k, (cout, cin, ksz, ksz))
                ).astype(jnp.float32)

    return {
        "c2_to_f2": conv_w(ks[0], inner_channel, c2, 1),
        "c3_to_f3": conv_w(ks[1], inner_channel, c3, 1),
        "c4_to_f4": conv_w(ks[2], inner_channel, c4, 1),
        "c5_to_f5": conv_w(ks[3], inner_channel, c5, 1),
        "p2_out": conv_w(ks[4], inner_channel, inner_channel, 3),
        "p3_out": conv_w(ks[5], inner_channel, inner_channel, 3),
        "p4_out": conv_w(ks[6], inner_channel, inner_channel, 3),
        "p5_out": conv_w(ks[7], inner_channel, inner_channel, 3),
    }


def fpn_forward(params, c2, c3, c4, c5):
    N = c2.shape[0]
    Cf = params["c2_to_f2"].shape[0]
    feats = (c2, c3, c4, c5)
    shapes = [f.shape[2:] for f in feats]                     # [(H, W), ...]

    # NCHW -> (N, C, H*W): pure reshape (no transposes), bf16 for MXU/DMA.
    xs = [f.reshape(f.shape[0], f.shape[1], f.shape[2] * f.shape[3])
          .astype(jnp.bfloat16) for f in feats]

    # Static operators (constants under jit), bf16.
    ups = [jnp.asarray(_upsample_matrix_t(shapes[i + 1][0], shapes[i + 1][1],
                                          shapes[i][0], shapes[i][1])
                       ).astype(jnp.bfloat16) for i in range(3)]

    wl = [params[k].reshape(Cf, -1).astype(jnp.bfloat16)
          for k in ("c2_to_f2", "c3_to_f3", "c4_to_f4", "c5_to_f5")]
    wo = [_pack_w3x3_flat(params[k]).astype(jnp.bfloat16)
          for k in ("p2_out", "p3_out", "p4_out", "p5_out")]

    Ws = [s[1] for s in shapes]

    # Top-down chain: one fused Pallas kernel per level; f handed off in bf16.
    p5, f5 = _run_level(xs[3], None, None, wl[3], wo[3], Ws[3], emit_f=True)
    p4, f4 = _run_level(xs[2], f5, ups[2], wl[2], wo[2], Ws[2], emit_f=True)
    p3, f3 = _run_level(xs[1], f4, ups[1], wl[1], wo[1], Ws[1], emit_f=True)
    p2 = _run_level(xs[0], f3, ups[0], wl[0], wo[0], Ws[0], emit_f=False)

    outs = [p2, p3, p4, p5]
    return [o.reshape(N, Cf, H, W) for o, (H, W) in zip(outs, shapes)]


# ------------------------- pure-JAX reference (check) -------------------------

def _ref_conv(x, w, pad):
    return lax.conv_general_dilated(
        x, w, window_strides=(1, 1), padding=[(pad, pad), (pad, pad)],
        dimension_numbers=("NCHW", "OIHW", "NCHW"))


def _ref_upsample(x, H, W):
    """nn.UpsamplingBilinear2d semantics (align_corners=True). x: NCHW."""
    _, _, h, w = x.shape

    def coords(out_len, in_len):
        if out_len == 1:
            src = jnp.zeros((1,), jnp.float32)
        else:
            src = jnp.arange(out_len, dtype=jnp.float32) * (
                (in_len - 1) / (out_len - 1))
        lo = jnp.clip(jnp.floor(src).astype(jnp.int32), 0, in_len - 1)
        hi = jnp.clip(lo + 1, 0, in_len - 1)
        return lo, hi, src - lo.astype(jnp.float32)

    y0, y1, fy = coords(H, h)
    x0, x1, fx = coords(W, w)
    r0, r1 = x[:, :, y0, :], x[:, :, y1, :]
    fxb = fx[None, None, None, :]
    top = r0[:, :, :, x0] * (1.0 - fxb) + r0[:, :, :, x1] * fxb
    bot = r1[:, :, :, x0] * (1.0 - fxb) + r1[:, :, :, x1] * fxb
    fyb = fy[None, None, :, None]
    return top * (1.0 - fyb) + bot * fyb


def fpn_reference(params, c2, c3, c4, c5):
    l2 = _ref_conv(c2, params["c2_to_f2"], 0)
    l3 = _ref_conv(c3, params["c3_to_f3"], 0)
    l4 = _ref_conv(c4, params["c4_to_f4"], 0)
    l5 = _ref_conv(c5, params["c5_to_f5"], 0)
    f4 = l4 + _ref_upsample(l5, l4.shape[2], l4.shape[3])
    f3 = l3 + _ref_upsample(f4, l3.shape[2], l3.shape[3])
    f2 = l2 + _ref_upsample(f3, l2.shape[2], l2.shape[3])
    return [_ref_conv(f2, params["p2_out"], 1),
            _ref_conv(f3, params["p3_out"], 1),
            _ref_conv(f4, params["p4_out"], 1),
            _ref_conv(l5, params["p5_out"], 1)]


# --------------------------------- main ---------------------------------------

if __name__ == "__main__":
    key = jax.random.PRNGKey(0)
    k_in, k_par = jax.random.split(key)
    kc2, kc3, kc4, kc5 = jax.random.split(k_in, 4)

    # Small pyramid consistent with a backbone: strides double, channels grow.
    N = 2
    C2, C3, C4, C5 = 8, 16, 32, 64
    inner = 32

    c2 = jax.random.normal(kc2, (N, C2, 16, 16), dtype=jnp.float32)
    c3 = jax.random.normal(kc3, (N, C3, 8, 8), dtype=jnp.float32)
    c4 = jax.random.normal(kc4, (N, C4, 4, 4), dtype=jnp.float32)
    c5 = jax.random.normal(kc5, (N, C5, 2, 2), dtype=jnp.float32)

    params = init_fpn_params(k_par, C2, C3, C4, C5, inner_channel=inner)

    fpn = jax.jit(fpn_forward)
    outs = fpn(params, c2, c3, c4, c5)
    outs = [jax.block_until_ready(o) for o in outs]

    expected_shapes = [(N, inner, 16, 16), (N, inner, 8, 8),
                       (N, inner, 4, 4), (N, inner, 2, 2)]
    assert [tuple(o.shape) for o in outs] == expected_shapes

    refs = fpn_reference(params, c2, c3, c4, c5)
    # Tolerance derivation: bf16 operands (rel eps ~ 2^-9..2^-8) on O(1)
    # activations through a depth-4 matmul chain with f32 accumulation give
    # an expected max abs error of ~1e-2; assert with ~4x margin.
    for o, r in zip(outs, refs):
        err = float(jnp.max(jnp.abs(o.astype(jnp.float32) - r)))
        assert err < 4e-2, "mismatch vs reference: max abs err %g" % err

    print("KERNEL_OK")
</pallas_src>

<mosaic_0001>
module attributes {stable_mosaic.version = 11 : i64} {
  func.func @kernel(%arg0: i32, %arg1: memref<1x16x64xbf16, #tpu.memory_space<vmem>>, %arg2: memref<1x32x16xbf16, #tpu.memory_space<vmem>>, %arg3: memref<16x64xbf16, #tpu.memory_space<vmem>>, %arg4: memref<32x16xbf16, #tpu.memory_space<vmem>>, %arg5: memref<32x288xbf16, #tpu.memory_space<vmem>>, %arg6: memref<1x32x64xf32, #tpu.memory_space<vmem>>, %arg7: memref<1x32x64xbf16, #tpu.memory_space<vmem>>, %arg8: memref<288x64xbf16, #tpu.memory_space<vmem>>) attributes {dimension_semantics = [#tpu.dimension_semantics<parallel>], iteration_bounds = array<i64: 2>, scalar_prefetch = 0 : i64, scratch_operands = 1 : i64, tpu.core_type = #tpu.core_type<tc>, window_params = [{transform_indices = @transform_0, window_bounds = array<i64: 1, 16, 64>}, {transform_indices = @transform_1, window_bounds = array<i64: 1, 32, 16>}, {pipeline_mode = #tpu.pipeline_mode<synchronous>, transform_indices = @transform_2, window_bounds = array<i64: 16, 64>}, {pipeline_mode = #tpu.pipeline_mode<synchronous>, transform_indices = @transform_3, window_bounds = array<i64: 32, 16>}, {pipeline_mode = #tpu.pipeline_mode<synchronous>, transform_indices = @transform_4, window_bounds = array<i64: 32, 288>}, {transform_indices = @transform_5, window_bounds = array<i64: 1, 32, 64>}, {transform_indices = @transform_6, window_bounds = array<i64: 1, 32, 64>}]} {
    %c0 = arith.constant 0 : index
    %c0_0 = arith.constant 0 : index
    %0 = vector.load %arg4[%c0, %c0_0] : memref<32x16xbf16, #tpu.memory_space<vmem>>, vector<32x16xbf16>
    %c0_1 = arith.constant 0 : index
    %c0_2 = arith.constant 0 : index
    %c0_3 = arith.constant 0 : index
    %1 = vector.load %arg1[%c0_1, %c0_2, %c0_3] : memref<1x16x64xbf16, #tpu.memory_space<vmem>>, vector<1x16x64xbf16>
    %2 = vector.shape_cast %1 : vector<1x16x64xbf16> to vector<16x64xbf16>
    %cst = arith.constant dense<0.000000e+00> : vector<32x64xf32>
    %3 = tpu.matmul %0, %2, %cst {dimension_numbers = #tpu.dot_dimension_numbers<[1], [0], [0], [1], [0, 0, 1, 1], [], []>} : vector<32x16xbf16>, vector<16x64xbf16>, vector<32x64xf32> -> vector<32x64xf32>
    %c0_4 = arith.constant 0 : index
    %c0_5 = arith.constant 0 : index
    %c0_6 = arith.constant 0 : index
    %4 = vector.load %arg2[%c0_4, %c0_5, %c0_6] : memref<1x32x16xbf16, #tpu.memory_space<vmem>>, vector<1x32x16xbf16>
    %5 = vector.shape_cast %4 : vector<1x32x16xbf16> to vector<32x16xbf16>
    %c0_7 = arith.constant 0 : index
    %c0_8 = arith.constant 0 : index
    %6 = vector.load %arg3[%c0_7, %c0_8] : memref<16x64xbf16, #tpu.memory_space<vmem>>, vector<16x64xbf16>
    %cst_9 = arith.constant dense<0.000000e+00> : vector<32x64xf32>
    %7 = tpu.matmul %5, %6, %cst_9 {dimension_numbers = #tpu.dot_dimension_numbers<[1], [0], [0], [1], [0, 0, 1, 1], [], []>} : vector<32x16xbf16>, vector<16x64xbf16>, vector<32x64xf32> -> vector<32x64xf32>
    %8 = arith.addf %3, %7 : vector<32x64xf32>
    %9 = arith.truncf %8 : vector<32x64xf32> to vector<32x64xbf16>
    %c0_10 = arith.constant 0 : index
    %c0_11 = arith.constant 0 : index
    %c0_12 = arith.constant 0 : index
    %10 = vector.load %arg7[%c0_10, %c0_11, %c0_12] : memref<1x32x64xbf16, #tpu.memory_space<vmem>>, vector<1x32x64xbf16>
    %11 = vector.shape_cast %10 : vector<1x32x64xbf16> to vector<32x64xbf16>
    %12 = vector.shape_cast %9 : vector<32x64xbf16> to vector<1x32x64xbf16>
    tpu.vector_store %arg7[%c0_10, %c0_11, %c0_12], %12 {strides = array<i32>} : memref<1x32x64xbf16, #tpu.memory_space<vmem>>, vector<1x32x64xbf16>,
    %13 = arith.truncf %8 : vector<32x64xf32> to vector<32x64xbf16>
    %14 = tpu.iota {dimensions = array<i32: 1>} : vector<32x64xi32>
    %c8_i32 = arith.constant 8 : i32
    %c0_i32 = arith.constant 0 : i32
    %15 = arith.cmpi eq, %c8_i32, %c0_i32 : i32
    %c1_i32 = arith.constant 1 : i32
    %16 = arith.select %15, %c1_i32, %c8_i32 : i32
    %17 = vector.broadcast %16 : i32 to vector<32x64xi32>
    %18 = arith.remsi %14, %17 : vector<32x64xi32>
    %c0_i32_13 = arith.constant 0 : i32
    %19 = vector.broadcast %c0_i32_13 : i32 to vector<32x64xi32>
    %20 = arith.cmpi ne, %18, %19 : vector<32x64xi32>
    %c0_i32_14 = arith.constant 0 : i32
    %21 = vector.broadcast %c0_i32_14 : i32 to vector<32x64xi32>
    %22 = arith.cmpi slt, %18, %21 : vector<32x64xi32>
    %c0_i32_15 = arith.constant 0 : i32
    %23 = arith.cmpi slt, %16, %c0_i32_15 : i32
    %24 = vector.broadcast %23 : i1 to vector<32x64xi1>
    %25 = vector.broadcast %24 : vector<32x64xi1> to vector<32x64xi1>
    %26 = arith.xori %22, %25 : vector<32x64xi1>
    %27 = arith.andi %26, %20 : vector<32x64xi1>
    %28 = vector.broadcast %16 : i32 to vector<32x64xi32>
    %29 = arith.addi %18, %28 : vector<32x64xi32>
    %30 = arith.select %27, %29, %18 : vector<32x64xi1>, vector<32x64xi32>
    %cst_16 = arith.constant 0.000000e+00 : bf16
    %31 = vector.broadcast %cst_16 : bf16 to vector<32x64xbf16>
    %c7_i32 = arith.constant 7 : i32
    %32 = vector.broadcast %c7_i32 : i32 to vector<32x64xi32>
    %33 = arith.cmpi eq, %30, %32 : vector<32x64xi32>
    %34 = arith.select %33, %31, %13 : vector<32x64xi1>, vector<32x64xbf16>
    %c0_i32_17 = arith.constant 0 : i32
    %35 = vector.broadcast %c0_i32_17 : i32 to vector<32x64xi32>
    %36 = arith.cmpi eq, %30, %35 : vector<32x64xi32>
    %37 = arith.select %36, %31, %13 : vector<32x64xi1>, vector<32x64xbf16>
    %cst_18 = arith.constant 0.000000e+00 : bf16
    %38 = vector.broadcast %cst_18 : bf16 to vector<288x64xbf16>
    %c0_19 = arith.constant 0 : index
    %c0_20 = arith.constant 0 : index
    %39 = vector.load %arg8[%c0_19, %c0_20] : memref<288x64xbf16, #tpu.memory_space<vmem>>, vector<288x64xbf16>
    tpu.vector_store %arg8[%c0_19, %c0_20], %38 {strides = array<i32>} : memref<288x64xbf16, #tpu.memory_space<vmem>>, vector<288x64xbf16>,
    %40 = vector.extract_strided_slice %34 {offsets = [0, 0], sizes = [32, 55], strides = [1, 1]} : vector<32x64xbf16> to vector<32x55xbf16>
    %c0_21 = arith.constant 0 : index
    %c9 = arith.constant 9 : index
    %41 = vector.load %arg8[%c0_21, %c9] : memref<288x64xbf16, #tpu.memory_space<vmem>>, vector<32x55xbf16>
    tpu.vector_store %arg8[%c0_21, %c9], %40 {strides = array<i32>} : memref<288x64xbf16, #tpu.memory_space<vmem>>, vector<32x55xbf16>,
    %42 = vector.extract_strided_slice %13 {offsets = [0, 0], sizes = [32, 56], strides = [1, 1]} : vector<32x64xbf16> to vector<32x56xbf16>
    %c32 = arith.constant 32 : index
    %c8 = arith.constant 8 : index
    %43 = vector.load %arg8[%c32, %c8] : memref<288x64xbf16, #tpu.memory_space<vmem>>, vector<32x56xbf16>
    tpu.vector_store %arg8[%c32, %c8], %42 {strides = array<i32>} : memref<288x64xbf16, #tpu.memory_space<vmem>>, vector<32x56xbf16>,
    %44 = vector.extract_strided_slice %37 {offsets = [0, 0], sizes = [32, 57], strides = [1, 1]} : vector<32x64xbf16> to vector<32x57xbf16>
    %c64 = arith.constant 64 : index
    %c7 = arith.constant 7 : index
    %45 = vector.load %arg8[%c64, %c7] : memref<288x64xbf16, #tpu.memory_space<vmem>>, vector<32x57xbf16>
    tpu.vector_store %arg8[%c64, %c7], %44 {strides = array<i32>} : memref<288x64xbf16, #tpu.memory_space<vmem>>, vector<32x57xbf16>,
    %46 = vector.extract_strided_slice %34 {offsets = [0, 0], sizes = [32, 63], strides = [1, 1]} : vector<32x64xbf16> to vector<32x63xbf16>
    %c96 = arith.constant 96 : index
    %c1 = arith.constant 1 : index
    %47 = vector.load %arg8[%c96, %c1] : memref<288x64xbf16, #tpu.memory_space<vmem>>, vector<32x63xbf16>
    tpu.vector_store %arg8[%c96, %c1], %46 {strides = array<i32>} : memref<288x64xbf16, #tpu.memory_space<vmem>>, vector<32x63xbf16>,
    %c128 = arith.constant 128 : index
    %c0_22 = arith.constant 0 : index
    %48 = vector.load %arg8[%c128, %c0_22] : memref<288x64xbf16, #tpu.memory_space<vmem>>, vector<32x64xbf16>
    tpu.vector_store %arg8[%c128, %c0_22], %13 {strides = array<i32>} : memref<288x64xbf16, #tpu.memory_space<vmem>>, vector<32x64xbf16>,
    %49 = vector.extract_strided_slice %37 {offsets = [0, 1], sizes = [32, 63], strides = [1, 1]} : vector<32x64xbf16> to vector<32x63xbf16>
    %c160 = arith.constant 160 : index
    %c0_23 = arith.constant 0 : index
    %50 = vector.load %arg8[%c160, %c0_23] : memref<288x64xbf16, #tpu.memory_space<vmem>>, vector<32x63xbf16>
    tpu.vector_store %arg8[%c160, %c0_23], %49 {strides = array<i32>} : memref<288x64xbf16, #tpu.memory_space<vmem>>, vector<32x63xbf16>,
    %51 = vector.extract_strided_slice %34 {offsets = [0, 7], sizes = [32, 57], strides = [1, 1]} : vector<32x64xbf16> to vector<32x57xbf16>
    %c192 = arith.constant 192 : index
    %c0_24 = arith.constant 0 : index
    %52 = vector.load %arg8[%c192, %c0_24] : memref<288x64xbf16, #tpu.memory_space<vmem>>, vector<32x57xbf16>
    tpu.vector_store %arg8[%c192, %c0_24], %51 {strides = array<i32>} : memref<288x64xbf16, #tpu.memory_space<vmem>>, vector<32x57xbf16>,
    %53 = vector.extract_strided_slice %13 {offsets = [0, 8], sizes = [32, 56], strides = [1, 1]} : vector<32x64xbf16> to vector<32x56xbf16>
    %c224 = arith.constant 224 : index
    %c0_25 = arith.constant 0 : index
    %54 = vector.load %arg8[%c224, %c0_25] : memref<288x64xbf16, #tpu.memory_space<vmem>>, vector<32x56xbf16>
    tpu.vector_store %arg8[%c224, %c0_25], %53 {strides = array<i32>} : memref<288x64xbf16, #tpu.memory_space<vmem>>, vector<32x56xbf16>,
    %55 = vector.extract_strided_slice %37 {offsets = [0, 9], sizes = [32, 55], strides = [1, 1]} : vector<32x64xbf16> to vector<32x55xbf16>
    %c256 = arith.constant 256 : index
    %c0_26 = arith.constant 0 : index
    %56 = vector.load %arg8[%c256, %c0_26] : memref<288x64xbf16, #tpu.memory_space<vmem>>, vector<32x55xbf16>
    tpu.vector_store %arg8[%c256, %c0_26], %55 {strides = array<i32>} : memref<288x64xbf16, #tpu.memory_space<vmem>>, vector<32x55xbf16>,
    %c0_27 = arith.constant 0 : index
    %c0_28 = arith.constant 0 : index
    %57 = vector.load %arg5[%c0_27, %c0_28] : memref<32x288xbf16, #tpu.memory_space<vmem>>, vector<32x288xbf16>
    %c0_29 = arith.constant 0 : index
    %c0_30 = arith.constant 0 : index
    %58 = vector.load %arg8[%c0_29, %c0_30] : memref<288x64xbf16, #tpu.memory_space<vmem>>, vector<288x64xbf16>
    %cst_31 = arith.constant dense<0.000000e+00> : vector<32x64xf32>
    %59 = tpu.matmul %57, %58, %cst_31 {dimension_numbers = #tpu.dot_dimension_numbers<[1], [0], [0], [1], [0, 0, 1, 1], [], []>} : vector<32x288xbf16>, vector<288x64xbf16>, vector<32x64xf32> -> vector<32x64xf32>
    %c0_32 = arith.constant 0 : index
    %c0_33 = arith.constant 0 : index
    %c0_34 = arith.constant 0 : index
    %60 = vector.load %arg6[%c0_32, %c0_33, %c0_34] : memref<1x32x64xf32, #tpu.memory_space<vmem>>, vector<1x32x64xf32>
    %61 = vector.shape_cast %60 : vector<1x32x64xf32> to vector<32x64xf32>
    %62 = vector.shape_cast %59 : vector<32x64xf32> to vector<1x32x64xf32>
    tpu.vector_store %arg6[%c0_32, %c0_33, %c0_34], %62 {strides = array<i32>} : memref<1x32x64xf32, #tpu.memory_space<vmem>>, vector<1x32x64xf32>,
    return
  }
  func.func @transform_0(%arg0: i32) -> (i32, i32, i32) {
    %c0_i32 = arith.constant 0 : i32
    %c0_i32_0 = arith.constant 0 : i32
    %c0_i32_1 = arith.constant 0 : i32
    return %arg0, %c0_i32, %c0_i32_0 : i32, i32, i32
  }
  func.func @transform_1(%arg0: i32) -> (i32, i32, i32) {
    %c0_i32 = arith.constant 0 : i32
    %c0_i32_0 = arith.constant 0 : i32
    %c0_i32_1 = arith.constant 0 : i32
    return %arg0, %c0_i32, %c0_i32_0 : i32, i32, i32
  }
  func.func @transform_2(%arg0: i32) -> (i32, i32) {
    %c0_i32 = arith.constant 0 : i32
    %c0_i32_0 = arith.constant 0 : i32
    %c0_i32_1 = arith.constant 0 : i32
    return %c0_i32, %c0_i32_0 : i32, i32
  }
  func.func @transform_3(%arg0: i32) -> (i32, i32) {
    %c0_i32 = arith.constant 0 : i32
    %c0_i32_0 = arith.constant 0 : i32
    %c0_i32_1 = arith.constant 0 : i32
    return %c0_i32, %c0_i32_0 : i32, i32
  }
  func.func @transform_4(%arg0: i32) -> (i32, i32) {
    %c0_i32 = arith.constant 0 : i32
    %c0_i32_0 = arith.constant 0 : i32
    %c0_i32_1 = arith.constant 0 : i32
    return %c0_i32, %c0_i32_0 : i32, i32
  }
  func.func @transform_5(%arg0: i32) -> (i32, i32, i32) {
    %c0_i32 = arith.constant 0 : i32
    %c0_i32_0 = arith.constant 0 : i32
    %c0_i32_1 = arith.constant 0 : i32
    return %arg0, %c0_i32, %c0_i32_0 : i32, i32, i32
  }
  func.func @transform_6(%arg0: i32) -> (i32, i32, i32) {
    %c0_i32 = arith.constant 0 : i32
    %c0_i32_0 = arith.constant 0 : i32
    %c0_i32_1 = arith.constant 0 : i32
    return %arg0, %c0_i32, %c0_i32_0 : i32, i32, i32
  }
}

module attributes {stable_mosaic.version = 11 : i64} {
  func.func @kernel(%arg0: i32, %arg1: memref<1x8x256xbf16, #tpu.memory_space<vmem>>, %arg2: memref<1x32x64xbf16, #tpu.memory_space<vmem>>, %arg3: memref<64x256xbf16, #tpu.memory_space<vmem>>, %arg4: memref<32x8xbf16, #tpu.memory_space<vmem>>, %arg5: memref<32x288xbf16, #tpu.memory_space<vmem>>, %arg6: memref<1x32x256xf32, #tpu.memory_space<vmem>>, %arg7: memref<288x256xbf16, #tpu.memory_space<vmem>>) attributes {dimension_semantics = [#tpu.dimension_semantics<parallel>], iteration_bounds = array<i64: 2>, scalar_prefetch = 0 : i64, scratch_operands = 1 : i64, tpu.core_type = #tpu.core_type<tc>, window_params = [{transform_indices = @transform_0, window_bounds = array<i64: 1, 8, 256>}, {transform_indices = @transform_1, window_bounds = array<i64: 1, 32, 64>}, {pipeline_mode = #tpu.pipeline_mode<synchronous>, transform_indices = @transform_2, window_bounds = array<i64: 64, 256>}, {pipeline_mode = #tpu.pipeline_mode<synchronous>, transform_indices = @transform_3, window_bounds = array<i64: 32, 8>}, {pipeline_mode = #tpu.pipeline_mode<synchronous>, transform_indices = @transform_4, window_bounds = array<i64: 32, 288>}, {transform_indices = @transform_5, window_bounds = array<i64: 1, 32, 256>}]} {
    %c0 = arith.constant 0 : index
    %c0_0 = arith.constant 0 : index
    %0 = vector.load %arg4[%c0, %c0_0] : memref<32x8xbf16, #tpu.memory_space<vmem>>, vector<32x8xbf16>
    %c0_1 = arith.constant 0 : index
    %c0_2 = arith.constant 0 : index
    %c0_3 = arith.constant 0 : index
    %1 = vector.load %arg1[%c0_1, %c0_2, %c0_3] : memref<1x8x256xbf16, #tpu.memory_space<vmem>>, vector<1x8x256xbf16>
    %2 = vector.shape_cast %1 : vector<1x8x256xbf16> to vector<8x256xbf16>
    %cst = arith.constant dense<0.000000e+00> : vector<32x256xf32>
    %3 = tpu.matmul %0, %2, %cst {dimension_numbers = #tpu.dot_dimension_numbers<[1], [0], [0], [1], [0, 0, 1, 1], [], []>} : vector<32x8xbf16>, vector<8x256xbf16>, vector<32x256xf32> -> vector<32x256xf32>
    %c0_4 = arith.constant 0 : index
    %c0_5 = arith.constant 0 : index
    %c0_6 = arith.constant 0 : index
    %4 = vector.load %arg2[%c0_4, %c0_5, %c0_6] : memref<1x32x64xbf16, #tpu.memory_space<vmem>>, vector<1x32x64xbf16>
    %5 = vector.shape_cast %4 : vector<1x32x64xbf16> to vector<32x64xbf16>
    %c0_7 = arith.constant 0 : index
    %c0_8 = arith.constant 0 : index
    %6 = vector.load %arg3[%c0_7, %c0_8] : memref<64x256xbf16, #tpu.memory_space<vmem>>, vector<64x256xbf16>
    %cst_9 = arith.constant dense<0.000000e+00> : vector<32x256xf32>
    %7 = tpu.matmul %5, %6, %cst_9 {dimension_numbers = #tpu.dot_dimension_numbers<[1], [0], [0], [1], [0, 0, 1, 1], [], []>} : vector<32x64xbf16>, vector<64x256xbf16>, vector<32x256xf32> -> vector<32x256xf32>
    %8 = arith.addf %3, %7 : vector<32x256xf32>
    %9 = arith.truncf %8 : vector<32x256xf32> to vector<32x256xbf16>
    %10 = tpu.iota {dimensions = array<i32: 1>} : vector<32x256xi32>
    %c16_i32 = arith.constant 16 : i32
    %c0_i32 = arith.constant 0 : i32
    %11 = arith.cmpi eq, %c16_i32, %c0_i32 : i32
    %c1_i32 = arith.constant 1 : i32
    %12 = arith.select %11, %c1_i32, %c16_i32 : i32
    %13 = vector.broadcast %12 : i32 to vector<32x256xi32>
    %14 = arith.remsi %10, %13 : vector<32x256xi32>
    %c0_i32_10 = arith.constant 0 : i32
    %15 = vector.broadcast %c0_i32_10 : i32 to vector<32x256xi32>
    %16 = arith.cmpi ne, %14, %15 : vector<32x256xi32>
    %c0_i32_11 = arith.constant 0 : i32
    %17 = vector.broadcast %c0_i32_11 : i32 to vector<32x256xi32>
    %18 = arith.cmpi slt, %14, %17 : vector<32x256xi32>
    %c0_i32_12 = arith.constant 0 : i32
    %19 = arith.cmpi slt, %12, %c0_i32_12 : i32
    %20 = vector.broadcast %19 : i1 to vector<32x256xi1>
    %21 = vector.broadcast %20 : vector<32x256xi1> to vector<32x256xi1>
    %22 = arith.xori %18, %21 : vector<32x256xi1>
    %23 = arith.andi %22, %16 : vector<32x256xi1>
    %24 = vector.broadcast %12 : i32 to vector<32x256xi32>
    %25 = arith.addi %14, %24 : vector<32x256xi32>
    %26 = arith.select %23, %25, %14 : vector<32x256xi1>, vector<32x256xi32>
    %cst_13 = arith.constant 0.000000e+00 : bf16
    %27 = vector.broadcast %cst_13 : bf16 to vector<32x256xbf16>
    %c15_i32 = arith.constant 15 : i32
    %28 = vector.broadcast %c15_i32 : i32 to vector<32x256xi32>
    %29 = arith.cmpi eq, %26, %28 : vector<32x256xi32>
    %30 = arith.select %29, %27, %9 : vector<32x256xi1>, vector<32x256xbf16>
    %c0_i32_14 = arith.constant 0 : i32
    %31 = vector.broadcast %c0_i32_14 : i32 to vector<32x256xi32>
    %32 = arith.cmpi eq, %26, %31 : vector<32x256xi32>
    %33 = arith.select %32, %27, %9 : vector<32x256xi1>, vector<32x256xbf16>
    %cst_15 = arith.constant 0.000000e+00 : bf16
    %34 = vector.broadcast %cst_15 : bf16 to vector<288x256xbf16>
    %c0_16 = arith.constant 0 : index
    %c0_17 = arith.constant 0 : index
    %35 = vector.load %arg7[%c0_16, %c0_17] : memref<288x256xbf16, #tpu.memory_space<vmem>>, vector<288x256xbf16>
    tpu.vector_store %arg7[%c0_16, %c0_17], %34 {strides = array<i32>} : memref<288x256xbf16, #tpu.memory_space<vmem>>, vector<288x256xbf16>,
    %36 = vector.extract_strided_slice %30 {offsets = [0, 0], sizes = [32, 239], strides = [1, 1]} : vector<32x256xbf16> to vector<32x239xbf16>
    %c0_18 = arith.constant 0 : index
    %c17 = arith.constant 17 : index
    %37 = vector.load %arg7[%c0_18, %c17] : memref<288x256xbf16, #tpu.memory_space<vmem>>, vector<32x239xbf16>
    tpu.vector_store %arg7[%c0_18, %c17], %36 {strides = array<i32>} : memref<288x256xbf16, #tpu.memory_space<vmem>>, vector<32x239xbf16>,
    %38 = vector.extract_strided_slice %9 {offsets = [0, 0], sizes = [32, 240], strides = [1, 1]} : vector<32x256xbf16> to vector<32x240xbf16>
    %c32 = arith.constant 32 : index
    %c16 = arith.constant 16 : index
    %39 = vector.load %arg7[%c32, %c16] : memref<288x256xbf16, #tpu.memory_space<vmem>>, vector<32x240xbf16>
    tpu.vector_store %arg7[%c32, %c16], %38 {strides = array<i32>} : memref<288x256xbf16, #tpu.memory_space<vmem>>, vector<32x240xbf16>,
    %40 = vector.extract_strided_slice %33 {offsets = [0, 0], sizes = [32, 241], strides = [1, 1]} : vector<32x256xbf16> to vector<32x241xbf16>
    %c64 = arith.constant 64 : index
    %c15 = arith.constant 15 : index
    %41 = vector.load %arg7[%c64, %c15] : memref<288x256xbf16, #tpu.memory_space<vmem>>, vector<32x241xbf16>
    tpu.vector_store %arg7[%c64, %c15], %40 {strides = array<i32>} : memref<288x256xbf16, #tpu.memory_space<vmem>>, vector<32x241xbf16>,
    %42 = vector.extract_strided_slice %30 {offsets = [0, 0], sizes = [32, 255], strides = [1, 1]} : vector<32x256xbf16> to vector<32x255xbf16>
    %c96 = arith.constant 96 : index
    %c1 = arith.constant 1 : index
    %43 = vector.load %arg7[%c96, %c1] : memref<288x256xbf16, #tpu.memory_space<vmem>>, vector<32x255xbf16>
    tpu.vector_store %arg7[%c96, %c1], %42 {strides = array<i32>} : memref<288x256xbf16, #tpu.memory_space<vmem>>, vector<32x255xbf16>,
    %c128 = arith.constant 128 : index
    %c0_19 = arith.constant 0 : index
    %44 = vector.load %arg7[%c128, %c0_19] : memref<288x256xbf16, #tpu.memory_space<vmem>>, vector<32x256xbf16>
    tpu.vector_store %arg7[%c128, %c0_19], %9 {strides = array<i32>} : memref<288x256xbf16, #tpu.memory_space<vmem>>, vector<32x256xbf16>,
    %45 = vector.extract_strided_slice %33 {offsets = [0, 1], sizes = [32, 255], strides = [1, 1]} : vector<32x256xbf16> to vector<32x255xbf16>
    %c160 = arith.constant 160 : index
    %c0_20 = arith.constant 0 : index
    %46 = vector.load %arg7[%c160, %c0_20] : memref<288x256xbf16, #tpu.memory_space<vmem>>, vector<32x255xbf16>
    tpu.vector_store %arg7[%c160, %c0_20], %45 {strides = array<i32>} : memref<288x256xbf16, #tpu.memory_space<vmem>>, vector<32x255xbf16>,
    %47 = vector.extract_strided_slice %30 {offsets = [0, 15], sizes = [32, 241], strides = [1, 1]} : vector<32x256xbf16> to vector<32x241xbf16>
    %c192 = arith.constant 192 : index
    %c0_21 = arith.constant 0 : index
    %48 = vector.load %arg7[%c192, %c0_21] : memref<288x256xbf16, #tpu.memory_space<vmem>>, vector<32x241xbf16>
    tpu.vector_store %arg7[%c192, %c0_21], %47 {strides = array<i32>} : memref<288x256xbf16, #tpu.memory_space<vmem>>, vector<32x241xbf16>,
    %49 = vector.extract_strided_slice %9 {offsets = [0, 16], sizes = [32, 240], strides = [1, 1]} : vector<32x256xbf16> to vector<32x240xbf16>
    %c224 = arith.constant 224 : index
    %c0_22 = arith.constant 0 : index
    %50 = vector.load %arg7[%c224, %c0_22] : memref<288x256xbf16, #tpu.memory_space<vmem>>, vector<32x240xbf16>
    tpu.vector_store %arg7[%c224, %c0_22], %49 {strides = array<i32>} : memref<288x256xbf16, #tpu.memory_space<vmem>>, vector<32x240xbf16>,
    %51 = vector.extract_strided_slice %33 {offsets = [0, 17], sizes = [32, 239], strides = [1, 1]} : vector<32x256xbf16> to vector<32x239xbf16>
    %c256 = arith.constant 256 : index
    %c0_23 = arith.constant 0 : index
    %52 = vector.load %arg7[%c256, %c0_23] : memref<288x256xbf16, #tpu.memory_space<vmem>>, vector<32x239xbf16>
    tpu.vector_store %arg7[%c256, %c0_23], %51 {strides = array<i32>} : memref<288x256xbf16, #tpu.memory_space<vmem>>, vector<32x239xbf16>,
    %c0_24 = arith.constant 0 : index
    %c0_25 = arith.constant 0 : index
    %53 = vector.load %arg5[%c0_24, %c0_25] : memref<32x288xbf16, #tpu.memory_space<vmem>>, vector<32x288xbf16>
    %c0_26 = arith.constant 0 : index
    %c0_27 = arith.constant 0 : index
    %54 = vector.load %arg7[%c0_26, %c0_27] : memref<288x256xbf16, #tpu.memory_space<vmem>>, vector<288x256xbf16>
    %cst_28 = arith.constant dense<0.000000e+00> : vector<32x256xf32>
    %55 = tpu.matmul %53, %54, %cst_28 {dimension_numbers = #tpu.dot_dimension_numbers<[1], [0], [0], [1], [0, 0, 1, 1], [], []>} : vector<32x288xbf16>, vector<288x256xbf16>, vector<32x256xf32> -> vector<32x256xf32>
    %c0_29 = arith.constant 0 : index
    %c0_30 = arith.constant 0 : index
    %c0_31 = arith.constant 0 : index
    %56 = vector.load %arg6[%c0_29, %c0_30, %c0_31] : memref<1x32x256xf32, #tpu.memory_space<vmem>>, vector<1x32x256xf32>
    %57 = vector.shape_cast %56 : vector<1x32x256xf32> to vector<32x256xf32>
    %58 = vector.shape_cast %55 : vector<32x256xf32> to vector<1x32x256xf32>
    tpu.vector_store %arg6[%c0_29, %c0_30, %c0_31], %58 {strides = array<i32>} : memref<1x32x256xf32, #tpu.memory_space<vmem>>, vector<1x32x256xf32>,
    return
  }
  func.func @transform_0(%arg0: i32) -> (i32, i32, i32) {
    %c0_i32 = arith.constant 0 : i32
    %c0_i32_0 = arith.constant 0 : i32
    %c0_i32_1 = arith.constant 0 : i32
    return %arg0, %c0_i32, %c0_i32_0 : i32, i32, i32
  }
  func.func @transform_1(%arg0: i32) -> (i32, i32, i32) {
    %c0_i32 = arith.constant 0 : i32
    %c0_i32_0 = arith.constant 0 : i32
    %c0_i32_1 = arith.constant 0 : i32
    return %arg0, %c0_i32, %c0_i32_0 : i32, i32, i32
  }
  func.func @transform_2(%arg0: i32) -> (i32, i32) {
    %c0_i32 = arith.constant 0 : i32
    %c0_i32_0 = arith.constant 0 : i32
    %c0_i32_1 = arith.constant 0 : i32
    return %c0_i32, %c0_i32_0 : i32, i32
  }
  func.func @transform_3(%arg0: i32) -> (i32, i32) {
    %c0_i32 = arith.constant 0 : i32
    %c0_i32_0 = arith.constant 0 : i32
    %c0_i32_1 = arith.constant 0 : i32
    return %c0_i32, %c0_i32_0 : i32, i32
  }
  func.func @transform_4(%arg0: i32) -> (i32, i32) {
    %c0_i32 = arith.constant 0 : i32
    %c0_i32_0 = arith.constant 0 : i32
    %c0_i32_1 = arith.constant 0 : i32
    return %c0_i32, %c0_i32_0 : i32, i32
  }
  func.func @transform_5(%arg0: i32) -> (i32, i32, i32) {
    %c0_i32 = arith.constant 0 : i32
    %c0_i32_0 = arith.constant 0 : i32
    %c0_i32_1 = arith.constant 0 : i32
    return %arg0, %c0_i32, %c0_i32_0 : i32, i32, i32
  }
}

module attributes {stable_mosaic.version = 11 : i64} {
  func.func @kernel(%arg0: i32, %arg1: memref<1x64x4xbf16, #tpu.memory_space<vmem>>, %arg2: memref<32x64xbf16, #tpu.memory_space<vmem>>, %arg3: memref<32x288xbf16, #tpu.memory_space<vmem>>, %arg4: memref<1x32x4xf32, #tpu.memory_space<vmem>>, %arg5: memref<1x32x4xbf16, #tpu.memory_space<vmem>>, %arg6: memref<288x4xbf16, #tpu.memory_space<vmem>>) attributes {dimension_semantics = [#tpu.dimension_semantics<parallel>], iteration_bounds = array<i64: 2>, scalar_prefetch = 0 : i64, scratch_operands = 1 : i64, tpu.core_type = #tpu.core_type<tc>, window_params = [{transform_indices = @transform_0, window_bounds = array<i64: 1, 64, 4>}, {pipeline_mode = #tpu.pipeline_mode<synchronous>, transform_indices = @transform_1, window_bounds = array<i64: 32, 64>}, {pipeline_mode = #tpu.pipeline_mode<synchronous>, transform_indices = @transform_2, window_bounds = array<i64: 32, 288>}, {transform_indices = @transform_3, window_bounds = array<i64: 1, 32, 4>}, {transform_indices = @transform_4, window_bounds = array<i64: 1, 32, 4>}]} {
    %c0 = arith.constant 0 : index
    %c0_0 = arith.constant 0 : index
    %0 = vector.load %arg2[%c0, %c0_0] : memref<32x64xbf16, #tpu.memory_space<vmem>>, vector<32x64xbf16>
    %c0_1 = arith.constant 0 : index
    %c0_2 = arith.constant 0 : index
    %c0_3 = arith.constant 0 : index
    %1 = vector.load %arg1[%c0_1, %c0_2, %c0_3] : memref<1x64x4xbf16, #tpu.memory_space<vmem>>, vector<1x64x4xbf16>
    %2 = vector.shape_cast %1 : vector<1x64x4xbf16> to vector<64x4xbf16>
    %cst = arith.constant dense<0.000000e+00> : vector<32x4xf32>
    %3 = tpu.matmul %0, %2, %cst {dimension_numbers = #tpu.dot_dimension_numbers<[1], [0], [0], [1], [0, 0, 1, 1], [], []>} : vector<32x64xbf16>, vector<64x4xbf16>, vector<32x4xf32> -> vector<32x4xf32>
    %4 = arith.truncf %3 : vector<32x4xf32> to vector<32x4xbf16>
    %c0_4 = arith.constant 0 : index
    %c0_5 = arith.constant 0 : index
    %c0_6 = arith.constant 0 : index
    %5 = vector.load %arg5[%c0_4, %c0_5, %c0_6] : memref<1x32x4xbf16, #tpu.memory_space<vmem>>, vector<1x32x4xbf16>
    %6 = vector.shape_cast %5 : vector<1x32x4xbf16> to vector<32x4xbf16>
    %7 = vector.shape_cast %4 : vector<32x4xbf16> to vector<1x32x4xbf16>
    tpu.vector_store %arg5[%c0_4, %c0_5, %c0_6], %7 {strides = array<i32>} : memref<1x32x4xbf16, #tpu.memory_space<vmem>>, vector<1x32x4xbf16>,
    %8 = arith.truncf %3 : vector<32x4xf32> to vector<32x4xbf16>
    %9 = tpu.iota {dimensions = array<i32: 1>} : vector<32x4xi32>
    %c2_i32 = arith.constant 2 : i32
    %c0_i32 = arith.constant 0 : i32
    %10 = arith.cmpi eq, %c2_i32, %c0_i32 : i32
    %c1_i32 = arith.constant 1 : i32
    %11 = arith.select %10, %c1_i32, %c2_i32 : i32
    %12 = vector.broadcast %11 : i32 to vector<32x4xi32>
    %13 = arith.remsi %9, %12 : vector<32x4xi32>
    %c0_i32_7 = arith.constant 0 : i32
    %14 = vector.broadcast %c0_i32_7 : i32 to vector<32x4xi32>
    %15 = arith.cmpi ne, %13, %14 : vector<32x4xi32>
    %c0_i32_8 = arith.constant 0 : i32
    %16 = vector.broadcast %c0_i32_8 : i32 to vector<32x4xi32>
    %17 = arith.cmpi slt, %13, %16 : vector<32x4xi32>
    %c0_i32_9 = arith.constant 0 : i32
    %18 = arith.cmpi slt, %11, %c0_i32_9 : i32
    %19 = vector.broadcast %18 : i1 to vector<32x4xi1>
    %20 = vector.broadcast %19 : vector<32x4xi1> to vector<32x4xi1>
    %21 = arith.xori %17, %20 : vector<32x4xi1>
    %22 = arith.andi %21, %15 : vector<32x4xi1>
    %23 = vector.broadcast %11 : i32 to vector<32x4xi32>
    %24 = arith.addi %13, %23 : vector<32x4xi32>
    %25 = arith.select %22, %24, %13 : vector<32x4xi1>, vector<32x4xi32>
    %cst_10 = arith.constant 0.000000e+00 : bf16
    %26 = vector.broadcast %cst_10 : bf16 to vector<32x4xbf16>
    %c1_i32_11 = arith.constant 1 : i32
    %27 = vector.broadcast %c1_i32_11 : i32 to vector<32x4xi32>
    %28 = arith.cmpi eq, %25, %27 : vector<32x4xi32>
    %29 = arith.select %28, %26, %8 : vector<32x4xi1>, vector<32x4xbf16>
    %c0_i32_12 = arith.constant 0 : i32
    %30 = vector.broadcast %c0_i32_12 : i32 to vector<32x4xi32>
    %31 = arith.cmpi eq, %25, %30 : vector<32x4xi32>
    %32 = arith.select %31, %26, %8 : vector<32x4xi1>, vector<32x4xbf16>
    %cst_13 = arith.constant 0.000000e+00 : bf16
    %33 = vector.broadcast %cst_13 : bf16 to vector<288x4xbf16>
    %c0_14 = arith.constant 0 : index
    %c0_15 = arith.constant 0 : index
    %34 = vector.load %arg6[%c0_14, %c0_15] : memref<288x4xbf16, #tpu.memory_space<vmem>>, vector<288x4xbf16>
    tpu.vector_store %arg6[%c0_14, %c0_15], %33 {strides = array<i32>} : memref<288x4xbf16, #tpu.memory_space<vmem>>, vector<288x4xbf16>,
    %35 = vector.extract_strided_slice %29 {offsets = [0, 0], sizes = [32, 1], strides = [1, 1]} : vector<32x4xbf16> to vector<32x1xbf16>
    %c0_16 = arith.constant 0 : index
    %c3 = arith.constant 3 : index
    %36 = vector.load %arg6[%c0_16, %c3] : memref<288x4xbf16, #tpu.memory_space<vmem>>, vector<32x1xbf16>
    tpu.vector_store %arg6[%c0_16, %c3], %35 {strides = array<i32>} : memref<288x4xbf16, #tpu.memory_space<vmem>>, vector<32x1xbf16>,
    %37 = vector.extract_strided_slice %8 {offsets = [0, 0], sizes = [32, 2], strides = [1, 1]} : vector<32x4xbf16> to vector<32x2xbf16>
    %c32 = arith.constant 32 : index
    %c2 = arith.constant 2 : index
    %38 = vector.load %arg6[%c32, %c2] : memref<288x4xbf16, #tpu.memory_space<vmem>>, vector<32x2xbf16>
    tpu.vector_store %arg6[%c32, %c2], %37 {strides = array<i32>} : memref<288x4xbf16, #tpu.memory_space<vmem>>, vector<32x2xbf16>,
    %39 = vector.extract_strided_slice %32 {offsets = [0, 0], sizes = [32, 3], strides = [1, 1]} : vector<32x4xbf16> to vector<32x3xbf16>
    %c64 = arith.constant 64 : index
    %c1 = arith.constant 1 : index
    %40 = vector.load %arg6[%c64, %c1] : memref<288x4xbf16, #tpu.memory_space<vmem>>, vector<32x3xbf16>
    tpu.vector_store %arg6[%c64, %c1], %39 {strides = array<i32>} : memref<288x4xbf16, #tpu.memory_space<vmem>>, vector<32x3xbf16>,
    %41 = vector.extract_strided_slice %29 {offsets = [0, 0], sizes = [32, 3], strides = [1, 1]} : vector<32x4xbf16> to vector<32x3xbf16>
    %c96 = arith.constant 96 : index
    %c1_17 = arith.constant 1 : index
    %42 = vector.load %arg6[%c96, %c1_17] : memref<288x4xbf16, #tpu.memory_space<vmem>>, vector<32x3xbf16>
    tpu.vector_store %arg6[%c96, %c1_17], %41 {strides = array<i32>} : memref<288x4xbf16, #tpu.memory_space<vmem>>, vector<32x3xbf16>,
    %c128 = arith.constant 128 : index
    %c0_18 = arith.constant 0 : index
    %43 = vector.load %arg6[%c128, %c0_18] : memref<288x4xbf16, #tpu.memory_space<vmem>>, vector<32x4xbf16>
    tpu.vector_store %arg6[%c128, %c0_18], %8 {strides = array<i32>} : memref<288x4xbf16, #tpu.memory_space<vmem>>, vector<32x4xbf16>,
    %44 = vector.extract_strided_slice %32 {offsets = [0, 1], sizes = [32, 3], strides = [1, 1]} : vector<32x4xbf16> to vector<32x3xbf16>
    %c160 = arith.constant 160 : index
    %c0_19 = arith.constant 0 : index
    %45 = vector.load %arg6[%c160, %c0_19] : memref<288x4xbf16, #tpu.memory_space<vmem>>, vector<32x3xbf16>
    tpu.vector_store %arg6[%c160, %c0_19], %44 {strides = array<i32>} : memref<288x4xbf16, #tpu.memory_space<vmem>>, vector<32x3xbf16>,
    %46 = vector.extract_strided_slice %29 {offsets = [0, 1], sizes = [32, 3], strides = [1, 1]} : vector<32x4xbf16> to vector<32x3xbf16>
    %c192 = arith.constant 192 : index
    %c0_20 = arith.constant 0 : index
    %47 = vector.load %arg6[%c192, %c0_20] : memref<288x4xbf16, #tpu.memory_space<vmem>>, vector<32x3xbf16>
    tpu.vector_store %arg6[%c192, %c0_20], %46 {strides = array<i32>} : memref<288x4xbf16, #tpu.memory_space<vmem>>, vector<32x3xbf16>,
    %48 = vector.extract_strided_slice %8 {offsets = [0, 2], sizes = [32, 2], strides = [1, 1]} : vector<32x4xbf16> to vector<32x2xbf16>
    %c224 = arith.constant 224 : index
    %c0_21 = arith.constant 0 : index
    %49 = vector.load %arg6[%c224, %c0_21] : memref<288x4xbf16, #tpu.memory_space<vmem>>, vector<32x2xbf16>
    tpu.vector_store %arg6[%c224, %c0_21], %48 {strides = array<i32>} : memref<288x4xbf16, #tpu.memory_space<vmem>>, vector<32x2xbf16>,
    %50 = vector.extract_strided_slice %32 {offsets = [0, 3], sizes = [32, 1], strides = [1, 1]} : vector<32x4xbf16> to vector<32x1xbf16>
    %c256 = arith.constant 256 : index
    %c0_22 = arith.constant 0 : index
    %51 = vector.load %arg6[%c256, %c0_22] : memref<288x4xbf16, #tpu.memory_space<vmem>>, vector<32x1xbf16>
    tpu.vector_store %arg6[%c256, %c0_22], %50 {strides = array<i32>} : memref<288x4xbf16, #tpu.memory_space<vmem>>, vector<32x1xbf16>,
    %c0_23 = arith.constant 0 : index
    %c0_24 = arith.constant 0 : index
    %52 = vector.load %arg3[%c0_23, %c0_24] : memref<32x288xbf16, #tpu.memory_space<vmem>>, vector<32x288xbf16>
    %c0_25 = arith.constant 0 : index
    %c0_26 = arith.constant 0 : index
    %53 = vector.load %arg6[%c0_25, %c0_26] : memref<288x4xbf16, #tpu.memory_space<vmem>>, vector<288x4xbf16>
    %cst_27 = arith.constant dense<0.000000e+00> : vector<32x4xf32>
    %54 = tpu.matmul %52, %53, %cst_27 {dimension_numbers = #tpu.dot_dimension_numbers<[1], [0], [0], [1], [0, 0, 1, 1], [], []>} : vector<32x288xbf16>, vector<288x4xbf16>, vector<32x4xf32> -> vector<32x4xf32>
    %c0_28 = arith.constant 0 : index
    %c0_29 = arith.constant 0 : index
    %c0_30 = arith.constant 0 : index
    %55 = vector.load %arg4[%c0_28, %c0_29, %c0_30] : memref<1x32x4xf32, #tpu.memory_space<vmem>>, vector<1x32x4xf32>
    %56 = vector.shape_cast %55 : vector<1x32x4xf32> to vector<32x4xf32>
    %57 = vector.shape_cast %54 : vector<32x4xf32> to vector<1x32x4xf32>
    tpu.vector_store %arg4[%c0_28, %c0_29, %c0_30], %57 {strides = array<i32>} : memref<1x32x4xf32, #tpu.memory_space<vmem>>, vector<1x32x4xf32>,
    return
  }
  func.func @transform_0(%arg0: i32) -> (i32, i32, i32) {
    %c0_i32 = arith.constant 0 : i32
    %c0_i32_0 = arith.constant 0 : i32
    %c0_i32_1 = arith.constant 0 : i32
    return %arg0, %c0_i32, %c0_i32_0 : i32, i32, i32
  }
  func.func @transform_1(%arg0: i32) -> (i32, i32) {
    %c0_i32 = arith.constant 0 : i32
    %c0_i32_0 = arith.constant 0 : i32
    %c0_i32_1 = arith.constant 0 : i32
    return %c0_i32, %c0_i32_0 : i32, i32
  }
  func.func @transform_2(%arg0: i32) -> (i32, i32) {
    %c0_i32 = arith.constant 0 : i32
    %c0_i32_0 = arith.constant 0 : i32
    %c0_i32_1 = arith.constant 0 : i32
    return %c0_i32, %c0_i32_0 : i32, i32
  }
  func.func @transform_3(%arg0: i32) -> (i32, i32, i32) {
    %c0_i32 = arith.constant 0 : i32
    %c0_i32_0 = arith.constant 0 : i32
    %c0_i32_1 = arith.constant 0 : i32
    return %arg0, %c0_i32, %c0_i32_0 : i32, i32, i32
  }
  func.func @transform_4(%arg0: i32) -> (i32, i32, i32) {
    %c0_i32 = arith.constant 0 : i32
    %c0_i32_0 = arith.constant 0 : i32
    %c0_i32_1 = arith.constant 0 : i32
    return %arg0, %c0_i32, %c0_i32_0 : i32, i32, i32
  }
}

module attributes {stable_mosaic.version = 11 : i64} {
  func.func @kernel(%arg0: i32, %arg1: memref<1x32x16xbf16, #tpu.memory_space<vmem>>, %arg2: memref<1x32x4xbf16, #tpu.memory_space<vmem>>, %arg3: memref<4x16xbf16, #tpu.memory_space<vmem>>, %arg4: memref<32x32xbf16, #tpu.memory_space<vmem>>, %arg5: memref<32x288xbf16, #tpu.memory_space<vmem>>, %arg6: memref<1x32x16xf32, #tpu.memory_space<vmem>>, %arg7: memref<1x32x16xbf16, #tpu.memory_space<vmem>>, %arg8: memref<288x16xbf16, #tpu.memory_space<vmem>>) attributes {dimension_semantics = [#tpu.dimension_semantics<parallel>], iteration_bounds = array<i64: 2>, scalar_prefetch = 0 : i64, scratch_operands = 1 : i64, tpu.core_type = #tpu.core_type<tc>, window_params = [{transform_indices = @transform_0, window_bounds = array<i64: 1, 32, 16>}, {transform_indices = @transform_1, window_bounds = array<i64: 1, 32, 4>}, {pipeline_mode = #tpu.pipeline_mode<synchronous>, transform_indices = @transform_2, window_bounds = array<i64: 4, 16>}, {pipeline_mode = #tpu.pipeline_mode<synchronous>, transform_indices = @transform_3, window_bounds = array<i64: 32, 32>}, {pipeline_mode = #tpu.pipeline_mode<synchronous>, transform_indices = @transform_4, window_bounds = array<i64: 32, 288>}, {transform_indices = @transform_5, window_bounds = array<i64: 1, 32, 16>}, {transform_indices = @transform_6, window_bounds = array<i64: 1, 32, 16>}]} {
    %c0 = arith.constant 0 : index
    %c0_0 = arith.constant 0 : index
    %0 = vector.load %arg4[%c0, %c0_0] : memref<32x32xbf16, #tpu.memory_space<vmem>>, vector<32x32xbf16>
    %c0_1 = arith.constant 0 : index
    %c0_2 = arith.constant 0 : index
    %c0_3 = arith.constant 0 : index
    %1 = vector.load %arg1[%c0_1, %c0_2, %c0_3] : memref<1x32x16xbf16, #tpu.memory_space<vmem>>, vector<1x32x16xbf16>
    %2 = vector.shape_cast %1 : vector<1x32x16xbf16> to vector<32x16xbf16>
    %cst = arith.constant dense<0.000000e+00> : vector<32x16xf32>
    %3 = tpu.matmul %0, %2, %cst {dimension_numbers = #tpu.dot_dimension_numbers<[1], [0], [0], [1], [0, 0, 1, 1], [], []>} : vector<32x32xbf16>, vector<32x16xbf16>, vector<32x16xf32> -> vector<32x16xf32>
    %c0_4 = arith.constant 0 : index
    %c0_5 = arith.constant 0 : index
    %c0_6 = arith.constant 0 : index
    %4 = vector.load %arg2[%c0_4, %c0_5, %c0_6] : memref<1x32x4xbf16, #tpu.memory_space<vmem>>, vector<1x32x4xbf16>
    %5 = vector.shape_cast %4 : vector<1x32x4xbf16> to vector<32x4xbf16>
    %c0_7 = arith.constant 0 : index
    %c0_8 = arith.constant 0 : index
    %6 = vector.load %arg3[%c0_7, %c0_8] : memref<4x16xbf16, #tpu.memory_space<vmem>>, vector<4x16xbf16>
    %cst_9 = arith.constant dense<0.000000e+00> : vector<32x16xf32>
    %7 = tpu.matmul %5, %6, %cst_9 {dimension_numbers = #tpu.dot_dimension_numbers<[1], [0], [0], [1], [0, 0, 1, 1], [], []>} : vector<32x4xbf16>, vector<4x16xbf16>, vector<32x16xf32> -> vector<32x16xf32>
    %8 = arith.addf %3, %7 : vector<32x16xf32>
    %9 = arith.truncf %8 : vector<32x16xf32> to vector<32x16xbf16>
    %c0_10 = arith.constant 0 : index
    %c0_11 = arith.constant 0 : index
    %c0_12 = arith.constant 0 : index
    %10 = vector.load %arg7[%c0_10, %c0_11, %c0_12] : memref<1x32x16xbf16, #tpu.memory_space<vmem>>, vector<1x32x16xbf16>
    %11 = vector.shape_cast %10 : vector<1x32x16xbf16> to vector<32x16xbf16>
    %12 = vector.shape_cast %9 : vector<32x16xbf16> to vector<1x32x16xbf16>
    tpu.vector_store %arg7[%c0_10, %c0_11, %c0_12], %12 {strides = array<i32>} : memref<1x32x16xbf16, #tpu.memory_space<vmem>>, vector<1x32x16xbf16>,
    %13 = arith.truncf %8 : vector<32x16xf32> to vector<32x16xbf16>
    %14 = tpu.iota {dimensions = array<i32: 1>} : vector<32x16xi32>
    %c4_i32 = arith.constant 4 : i32
    %c0_i32 = arith.constant 0 : i32
    %15 = arith.cmpi eq, %c4_i32, %c0_i32 : i32
    %c1_i32 = arith.constant 1 : i32
    %16 = arith.select %15, %c1_i32, %c4_i32 : i32
    %17 = vector.broadcast %16 : i32 to vector<32x16xi32>
    %18 = arith.remsi %14, %17 : vector<32x16xi32>
    %c0_i32_13 = arith.constant 0 : i32
    %19 = vector.broadcast %c0_i32_13 : i32 to vector<32x16xi32>
    %20 = arith.cmpi ne, %18, %19 : vector<32x16xi32>
    %c0_i32_14 = arith.constant 0 : i32
    %21 = vector.broadcast %c0_i32_14 : i32 to vector<32x16xi32>
    %22 = arith.cmpi slt, %18, %21 : vector<32x16xi32>
    %c0_i32_15 = arith.constant 0 : i32
    %23 = arith.cmpi slt, %16, %c0_i32_15 : i32
    %24 = vector.broadcast %23 : i1 to vector<32x16xi1>
    %25 = vector.broadcast %24 : vector<32x16xi1> to vector<32x16xi1>
    %26 = arith.xori %22, %25 : vector<32x16xi1>
    %27 = arith.andi %26, %20 : vector<32x16xi1>
    %28 = vector.broadcast %16 : i32 to vector<32x16xi32>
    %29 = arith.addi %18, %28 : vector<32x16xi32>
    %30 = arith.select %27, %29, %18 : vector<32x16xi1>, vector<32x16xi32>
    %cst_16 = arith.constant 0.000000e+00 : bf16
    %31 = vector.broadcast %cst_16 : bf16 to vector<32x16xbf16>
    %c3_i32 = arith.constant 3 : i32
    %32 = vector.broadcast %c3_i32 : i32 to vector<32x16xi32>
    %33 = arith.cmpi eq, %30, %32 : vector<32x16xi32>
    %34 = arith.select %33, %31, %13 : vector<32x16xi1>, vector<32x16xbf16>
    %c0_i32_17 = arith.constant 0 : i32
    %35 = vector.broadcast %c0_i32_17 : i32 to vector<32x16xi32>
    %36 = arith.cmpi eq, %30, %35 : vector<32x16xi32>
    %37 = arith.select %36, %31, %13 : vector<32x16xi1>, vector<32x16xbf16>
    %cst_18 = arith.constant 0.000000e+00 : bf16
    %38 = vector.broadcast %cst_18 : bf16 to vector<288x16xbf16>
    %c0_19 = arith.constant 0 : index
    %c0_20 = arith.constant 0 : index
    %39 = vector.load %arg8[%c0_19, %c0_20] : memref<288x16xbf16, #tpu.memory_space<vmem>>, vector<288x16xbf16>
    tpu.vector_store %arg8[%c0_19, %c0_20], %38 {strides = array<i32>} : memref<288x16xbf16, #tpu.memory_space<vmem>>, vector<288x16xbf16>,
    %40 = vector.extract_strided_slice %34 {offsets = [0, 0], sizes = [32, 11], strides = [1, 1]} : vector<32x16xbf16> to vector<32x11xbf16>
    %c0_21 = arith.constant 0 : index
    %c5 = arith.constant 5 : index
    %41 = vector.load %arg8[%c0_21, %c5] : memref<288x16xbf16, #tpu.memory_space<vmem>>, vector<32x11xbf16>
    tpu.vector_store %arg8[%c0_21, %c5], %40 {strides = array<i32>} : memref<288x16xbf16, #tpu.memory_space<vmem>>, vector<32x11xbf16>,
    %42 = vector.extract_strided_slice %13 {offsets = [0, 0], sizes = [32, 12], strides = [1, 1]} : vector<32x16xbf16> to vector<32x12xbf16>
    %c32 = arith.constant 32 : index
    %c4 = arith.constant 4 : index
    %43 = vector.load %arg8[%c32, %c4] : memref<288x16xbf16, #tpu.memory_space<vmem>>, vector<32x12xbf16>
    tpu.vector_store %arg8[%c32, %c4], %42 {strides = array<i32>} : memref<288x16xbf16, #tpu.memory_space<vmem>>, vector<32x12xbf16>,
    %44 = vector.extract_strided_slice %37 {offsets = [0, 0], sizes = [32, 13], strides = [1, 1]} : vector<32x16xbf16> to vector<32x13xbf16>
    %c64 = arith.constant 64 : index
    %c3 = arith.constant 3 : index
    %45 = vector.load %arg8[%c64, %c3] : memref<288x16xbf16, #tpu.memory_space<vmem>>, vector<32x13xbf16>
    tpu.vector_store %arg8[%c64, %c3], %44 {strides = array<i32>} : memref<288x16xbf16, #tpu.memory_space<vmem>>, vector<32x13xbf16>,
    %46 = vector.extract_strided_slice %34 {offsets = [0, 0], sizes = [32, 15], strides = [1, 1]} : vector<32x16xbf16> to vector<32x15xbf16>
    %c96 = arith.constant 96 : index
    %c1 = arith.constant 1 : index
    %47 = vector.load %arg8[%c96, %c1] : memref<288x16xbf16, #tpu.memory_space<vmem>>, vector<32x15xbf16>
    tpu.vector_store %arg8[%c96, %c1], %46 {strides = array<i32>} : memref<288x16xbf16, #tpu.memory_space<vmem>>, vector<32x15xbf16>,
    %c128 = arith.constant 128 : index
    %c0_22 = arith.constant 0 : index
    %48 = vector.load %arg8[%c128, %c0_22] : memref<288x16xbf16, #tpu.memory_space<vmem>>, vector<32x16xbf16>
    tpu.vector_store %arg8[%c128, %c0_22], %13 {strides = array<i32>} : memref<288x16xbf16, #tpu.memory_space<vmem>>, vector<32x16xbf16>,
    %49 = vector.extract_strided_slice %37 {offsets = [0, 1], sizes = [32, 15], strides = [1, 1]} : vector<32x16xbf16> to vector<32x15xbf16>
    %c160 = arith.constant 160 : index
    %c0_23 = arith.constant 0 : index
    %50 = vector.load %arg8[%c160, %c0_23] : memref<288x16xbf16, #tpu.memory_space<vmem>>, vector<32x15xbf16>
    tpu.vector_store %arg8[%c160, %c0_23], %49 {strides = array<i32>} : memref<288x16xbf16, #tpu.memory_space<vmem>>, vector<32x15xbf16>,
    %51 = vector.extract_strided_slice %34 {offsets = [0, 3], sizes = [32, 13], strides = [1, 1]} : vector<32x16xbf16> to vector<32x13xbf16>
    %c192 = arith.constant 192 : index
    %c0_24 = arith.constant 0 : index
    %52 = vector.load %arg8[%c192, %c0_24] : memref<288x16xbf16, #tpu.memory_space<vmem>>, vector<32x13xbf16>
    tpu.vector_store %arg8[%c192, %c0_24], %51 {strides = array<i32>} : memref<288x16xbf16, #tpu.memory_space<vmem>>, vector<32x13xbf16>,
    %53 = vector.extract_strided_slice %13 {offsets = [0, 4], sizes = [32, 12], strides = [1, 1]} : vector<32x16xbf16> to vector<32x12xbf16>
    %c224 = arith.constant 224 : index
    %c0_25 = arith.constant 0 : index
    %54 = vector.load %arg8[%c224, %c0_25] : memref<288x16xbf16, #tpu.memory_space<vmem>>, vector<32x12xbf16>
    tpu.vector_store %arg8[%c224, %c0_25], %53 {strides = array<i32>} : memref<288x16xbf16, #tpu.memory_space<vmem>>, vector<32x12xbf16>,
    %55 = vector.extract_strided_slice %37 {offsets = [0, 5], sizes = [32, 11], strides = [1, 1]} : vector<32x16xbf16> to vector<32x11xbf16>
    %c256 = arith.constant 256 : index
    %c0_26 = arith.constant 0 : index
    %56 = vector.load %arg8[%c256, %c0_26] : memref<288x16xbf16, #tpu.memory_space<vmem>>, vector<32x11xbf16>
    tpu.vector_store %arg8[%c256, %c0_26], %55 {strides = array<i32>} : memref<288x16xbf16, #tpu.memory_space<vmem>>, vector<32x11xbf16>,
    %c0_27 = arith.constant 0 : index
    %c0_28 = arith.constant 0 : index
    %57 = vector.load %arg5[%c0_27, %c0_28] : memref<32x288xbf16, #tpu.memory_space<vmem>>, vector<32x288xbf16>
    %c0_29 = arith.constant 0 : index
    %c0_30 = arith.constant 0 : index
    %58 = vector.load %arg8[%c0_29, %c0_30] : memref<288x16xbf16, #tpu.memory_space<vmem>>, vector<288x16xbf16>
    %cst_31 = arith.constant dense<0.000000e+00> : vector<32x16xf32>
    %59 = tpu.matmul %57, %58, %cst_31 {dimension_numbers = #tpu.dot_dimension_numbers<[1], [0], [0], [1], [0, 0, 1, 1], [], []>} : vector<32x288xbf16>, vector<288x16xbf16>, vector<32x16xf32> -> vector<32x16xf32>
    %c0_32 = arith.constant 0 : index
    %c0_33 = arith.constant 0 : index
    %c0_34 = arith.constant 0 : index
    %60 = vector.load %arg6[%c0_32, %c0_33, %c0_34] : memref<1x32x16xf32, #tpu.memory_space<vmem>>, vector<1x32x16xf32>
    %61 = vector.shape_cast %60 : vector<1x32x16xf32> to vector<32x16xf32>
    %62 = vector.shape_cast %59 : vector<32x16xf32> to vector<1x32x16xf32>
    tpu.vector_store %arg6[%c0_32, %c0_33, %c0_34], %62 {strides = array<i32>} : memref<1x32x16xf32, #tpu.memory_space<vmem>>, vector<1x32x16xf32>,
    return
  }
  func.func @transform_0(%arg0: i32) -> (i32, i32, i32) {
    %c0_i32 = arith.constant 0 : i32
    %c0_i32_0 = arith.constant 0 : i32
    %c0_i32_1 = arith.constant 0 : i32
    return %arg0, %c0_i32, %c0_i32_0 : i32, i32, i32
  }
  func.func @transform_1(%arg0: i32) -> (i32, i32, i32) {
    %c0_i32 = arith.constant 0 : i32
    %c0_i32_0 = arith.constant 0 : i32
    %c0_i32_1 = arith.constant 0 : i32
    return %arg0, %c0_i32, %c0_i32_0 : i32, i32, i32
  }
  func.func @transform_2(%arg0: i32) -> (i32, i32) {
    %c0_i32 = arith.constant 0 : i32
    %c0_i32_0 = arith.constant 0 : i32
    %c0_i32_1 = arith.constant 0 : i32
    return %c0_i32, %c0_i32_0 : i32, i32
  }
  func.func @transform_3(%arg0: i32) -> (i32, i32) {
    %c0_i32 = arith.constant 0 : i32
    %c0_i32_0 = arith.constant 0 : i32
    %c0_i32_1 = arith.constant 0 : i32
    return %c0_i32, %c0_i32_0 : i32, i32
  }
  func.func @transform_4(%arg0: i32) -> (i32, i32) {
    %c0_i32 = arith.constant 0 : i32
    %c0_i32_0 = arith.constant 0 : i32
    %c0_i32_1 = arith.constant 0 : i32
    return %c0_i32, %c0_i32_0 : i32, i32
  }
  func.func @transform_5(%arg0: i32) -> (i32, i32, i32) {
    %c0_i32 = arith.constant 0 : i32
    %c0_i32_0 = arith.constant 0 : i32
    %c0_i32_1 = arith.constant 0 : i32
    return %arg0, %c0_i32, %c0_i32_0 : i32, i32, i32
  }
  func.func @transform_6(%arg0: i32) -> (i32, i32, i32) {
    %c0_i32 = arith.constant 0 : i32
    %c0_i32_0 = arith.constant 0 : i32
    %c0_i32_1 = arith.constant 0 : i32
    return %arg0, %c0_i32, %c0_i32_0 : i32, i32, i32
  }
}

</mosaic_0001>

<bundles_post_ra>
// kernel: fpn_forward.6
= control target key start
LH: loop header
LB: loop body
LE: loop exit
PB: predicated region body
PF: predicated region fallthrough
CT: control target
= control target key end

     0   :  { %s1050_s21 = smov 0   ;;  %s1139_s0 = inlined_call_operand.vmem [shape: bf16[2,16,64], index: 0, kind: input, shape index: {}]   ;;  %s1140_s1 = inlined_call_operand.vmem [shape: bf16[2,32,16], index: 1, kind: input, shape index: {}]   ;;  %s1141_s2 = inlined_call_operand.vmem [shape: bf16[16,64], index: 2, kind: input, shape index: {}]   ;;  %s1142_s3 = inlined_call_operand.vmem [shape: bf16[32,16], index: 3, kind: input, shape index: {}]   ;;  %s1143_s4 = inlined_call_operand.vmem [shape: bf16[32,288], index: 4, kind: input, shape index: {}]   ;;  %s1144_s5 = inlined_call_operand.vmem [shape: f32[2,32,64], index: 5, kind: output, shape index: {0}]   ;;  %s1145_s6 = inlined_call_operand.vmem [shape: bf16[2,32,64], index: 6, kind: output, shape index: {1}]  }
   0x1 LB: > { %s860_s22 = sadd.s32 4294967295, %s1004_s21   ;;  %p864_p0 = scmp.ge.s32.totalorder %s1004_s21, 1  ;;  %s1004_s21 = sphi %s1050_s21, %s17_s21  }
   0x2   : > { %p225_p1 = scmp.lt.s32.totalorder %s1004_s21, 3 }
   0x4   : > { %p226_p2 = pnand %p864_p0, %p225_p1 }
   0x5   : > { %v984_v0 = vld [vmem:[%s1141_s2] sm:$0xff] (!%p226_p2)   ;;  %p265_p3 = scmp.lt.s32.totalorder (!%p226_p2), %s860_s22, 1  ;;  %vm316_vm0 = vcmask (!%p226_p2), 130048   ;;  %v989_v5 = vld [vmem:[%s1142_s3 + $0x8] sm:$0xff] (!%p226_p2)   ;;  %vm498_vm1 = vcmask (!%p226_p2), 523264   ;;  %v1006_v6 = vmov (!%p226_p2), 0   ;;  %v464_v7 = vlaneseq (!%p226_p2) }
   0x6   : > { %229 = sbr.rel (%p226_p2) target bundleno = 631 (0x277), region = 40  ;;  %943 = vmatprep.subr.bf16.mxu0 (!%p226_p2), %v984_v0  ;;  %v988_v1 = vld [vmem:[%s1142_s3] sm:$0xff] (!%p226_p2)   ;;  %508 = vst.msk [vmem:[#allocation2 + $0x48] sm:$0xff] (!%p226_p2), %vm498_vm1, %v1006_v6  ;;  %499 = vst.msk [vmem:[#allocation2] sm:$0xff] (!%p226_p2), %vm498_vm1, %v1006_v6  ;;  %vm459_vm6 = vcmask (!%p226_p2), 519168   ;;  %s1007_s16 = smov (!%p226_p2), 127  }
   0x7   : > { %944 = vmatpush3.bf16.msra.mxu0 (!%p226_p2), %v984_v0  ;;  %500 = vst.msk [vmem:[#allocation2 + $0x8] sm:$0xff] (!%p226_p2), %vm498_vm1, %v1006_v6  ;;  %501 = vst.msk [vmem:[#allocation2 + $0x10] sm:$0xff] (!%p226_p2), %vm498_vm1, %v1006_v6  ;;  %v465_v8 = vand.u32 (!%p226_p2), 127, %v464_v7  ;;  %v482_v10 = vshrl.u32 (!%p226_p2), %v464_v7, 7  ;;  %s1008_s17 = smov (!%p226_p2), 9   ;;  %s1009_s18 = smov (!%p226_p2), 8  }
   0x8   : > { %502 = vst.msk [vmem:[#allocation2 + $0x18] sm:$0xff] (!%p226_p2), %vm498_vm1, %v1006_v6  ;;  %503 = vst.msk [vmem:[#allocation2 + $0x20] sm:$0xff] (!%p226_p2), %vm498_vm1, %v1006_v6  ;;  %s1010_s19 = smov (!%p226_p2), 7   ;;  %s1011_s20 = smov (!%p226_p2), 121   ;;  %v992_v31 = vld [vmem:[%s1143_s4 + $0x4] ss:$12 sps:$4 sm:$0xff] (!%p226_p2)  }
   0x9   : > { %504 = vst.msk [vmem:[#allocation2 + $0x28] sm:$0xff] (!%p226_p2), %vm498_vm1, %v1006_v6  ;;  %505 = vst.msk [vmem:[#allocation2 + $0x30] sm:$0xff] (!%p226_p2), %vm498_vm1, %v1006_v6  ;;  %v470_v9 = vand.u32 (!%p226_p2), 7, %v465_v8  ;;  %v483_v11 = vsub.s32 (!%p226_p2), 0, %v482_v10  ;;  %s1012_s23 = smov (!%p226_p2), 1   ;;  %s1013_s24 = smov (!%p226_p2), 120   ;;  %690 = vmatprep.mubr.bf16.mxu1 (!%p226_p2), %v992_v31 }
   0xa   : > { %506 = vst.msk [vmem:[#allocation2 + $0x38] sm:$0xff] (!%p226_p2), %vm498_vm1, %v1006_v6  ;;  %507 = vst.msk [vmem:[#allocation2 + $0x40] sm:$0xff] (!%p226_p2), %vm498_vm1, %v1006_v6  ;;  %s1014_s27 = smov (!%p226_p2), 119   ;;  %v993_v32 = vld [vmem:[%s1143_s4 + $0x8] ss:$12 sps:$4 sm:$0xff] (!%p226_p2)   ;;  %vm651_vm9 = vcmask (!%p226_p2), 261120  }
   0xb   : > { %509 = vst.msk [vmem:[#allocation2 + $0x50] sm:$0xff] (!%p226_p2), %vm498_vm1, %v1006_v6  ;;  %510 = vst.msk [vmem:[#allocation2 + $0x58] sm:$0xff] (!%p226_p2), %vm498_vm1, %v1006_v6  ;;  %vm488_vm2 = vcmp.eq.s32.totalorder (!%p226_p2), %v470_v9, 0  ;;  %vm478_vm3 = vcmp.eq.s32.totalorder (!%p226_p2), %v470_v9, 7  ;;  %vm565_vm10 = vcmask (!%p226_p2), 515072   ;;  %vm525_vm11 = vcmask (!%p226_p2), 523336  }
   0xc   : > { %511 = vst.msk [vmem:[#allocation2 + $0x60] sm:$0xff] (!%p226_p2), %vm498_vm1, %v1006_v6  ;;  %512 = vst.msk [vmem:[#allocation2 + $0x68] sm:$0xff] (!%p226_p2), %vm498_vm1, %v1006_v6  ;;  %vm534_vm12 = vcmask (!%p226_p2), 523328   ;;  %vm545_vm13 = vcmask (!%p226_p2), 523320   ;;  %vm574_vm14 = vcmask (!%p226_p2), 465920   ;;  %vm554_vm15 = vcmask (!%p226_p2), 523272  }
   0xd   : > { %s1147_s22 = smov (!%p265_p3, %s860_s22), 1  ;;  %513 = vst.msk [vmem:[#allocation2 + $0x70] sm:$0xff] %vm498_vm1, %v1006_v6  ;;  %514 = vst.msk [vmem:[#allocation2 + $0x78] sm:$0xff] %vm498_vm1, %v1006_v6 }
   0xe   : > { %s898_s25 = sshll.u32 %s1147_s22, 4  ;;  %s897_s26 = sshll.u32 %s1147_s22, 3  ;;  %515 = vst.msk [vmem:[#allocation2 + $0x80] sm:$0xff] %vm498_vm1, %v1006_v6  ;;  %516 = vst.msk [vmem:[#allocation2 + $0x88] sm:$0xff] %vm498_vm1, %v1006_v6 }
   0xf   : > { %s274_s29 = scalar_lea.vmem %s1140_s1, %s898_s25  ;;  %s269_s10 = scalar_lea.vmem %s1139_s0, %s897_s26  ;;  %vm489_vm4 = vmpackc.low %vm488_vm2, %vm488_vm2  ;;  %vm592_vm2 = vcmask 449536  }
  0x10   : > { %v985_v2 = vld [vmem:[%s274_s29] sm:$0xff]   ;;  %v987_v4 = vld [vmem:[%s274_s29 + $0x8] sm:$0xff]   ;;  %vm479_vm5 = vmpackc.low %vm478_vm3, %vm478_vm3  ;;  %v490_v12 = vsel %vm489_vm4, 65537, %v1006_v6  ;;  %s284_s15 = scalar_lea.vmem %s1145_s6, %s898_s25  ;;  %s899_s14 = sshll.u32 %s1147_s22, 5 }
  0x11   : > { %v986_v3 = vld [vmem:[%s269_s10] sm:$0xff]   ;;  %945 = vmatprep.mubr.msk.bf16.mxu0 %vm316_vm0, %v985_v2  ;;  %v480_v13 = vsel %vm479_vm5, 65537, %v1006_v6  ;;  %v494_v14 = vrot.slane %v490_v12, %v483_v11  ;;  %v995_v2 = vld [vmem:[%s1143_s4 + $0x1c] ss:$12 sps:$4 sm:$0xff]  }
  0x12   : > { %949 = vmatprep.subr.bf16.mxu0 %v986_v3  ;;  %946 = vmatmul.mubr.msk.bf16.vlgmr.msra.gmra.mrb[0].mxu0 %vm316_vm0, %v987_v4  ;;  %v484_v15 = vrot.slane %v480_v13, %v483_v11  ;;  %v994_v4 = vld [vmem:[%s1143_s4 + $0x20] ss:$12 sps:$4 sm:$0xff]  }
  0x13   : > { %950 = vmatpush3.bf16.msra.mxu0 %v986_v3  ;;  %951 = vmatprep.mubr.msk.bf16.mxu0 %vm316_vm0, %v988_v1  ;;  %vm495_vm7 = vcmp.ne.s16.totalorder %v494_v14, 0  ;;  %v990_v1 = vld [vmem:[%s1143_s4] ss:$12 sps:$4 sm:$0xff]  }
  0x14   : > { %vm485_vm8 = vcmp.ne.s16.totalorder %v484_v15, 0 }
  0x1e   : > { %952 = vmatmul.mubr.msk.bf16.vlgmr.msra.gmra.mrb[0].mxu0 %vm316_vm0, %v989_v5  ;;  %vm583_vm0 = vcmask 457728   ;;  %v997_v5 = vld [vmem:[%s1143_s4 + $0x18] ss:$12 sps:$4 sm:$0xff]  }
  0x1f   : > { %959 = vmatprep.mubr.msk.bf16.mxu0 %vm651_vm9, %v993_v32 }
  0xf1   : > { %v953_v16 = vpop.f32.mrb[0].mxu0 }
  0xf2   : > { %v903_v17 = vpack.c.bf16 %v953_v16, %v953_v16  ;;  %v428_v18 = vpop.f32.mrb[1].mxu0 }
  0xf3   : > { %v901_v19 = vpack.c.bf16 %v428_v18, %v428_v18  ;;  %v954_v20 = vpop.f32.mrb[2].mxu0 }
  0xf4   : > { %462 = vst.msk [vmem:[%s284_s15 + $0x8] sm:$0xf] %vm459_vm6, %v903_v17  ;;  %v444_v21 = vpack.c.bf16 %v954_v20, %v953_v16  ;;  %v904_v22 = vpack.c.bf16 %v954_v20, %v954_v20  ;;  %v431_v23 = vpop.f32.mrb[3].mxu0 }
  0xf5   : > { %460 = vst.msk [vmem:[%s284_s15] sm:$0xf] %vm459_vm6, %v901_v19  ;;  %v443_v24 = vpack.c.bf16 %v431_v23, %v428_v18  ;;  %v902_v25 = vpack.c.bf16 %v431_v23, %v431_v23 }
  0xf6   : > { %463 = vst.msk [vmem:[%s284_s15 + $0xc] sm:$0xf] %vm459_vm6, %v904_v22  ;;  %v487_v26 = vsel %vm485_vm8, 0, %v444_v21  ;;  %v497_v27 = vsel %vm495_vm7, 0, %v444_v21 }
  0xf7   : > { %558 = vst.msk [vmem:[#allocation2 + $0x48] sm:$0xff] %vm498_vm1, %v444_v21  ;;  %557 = vst.msk [vmem:[#allocation2 + $0x40] sm:$0xff] %vm498_vm1, %v443_v24  ;;  %v496_v28 = vsel %vm495_vm7, 0, %v443_v24  ;;  %v486_v29 = vsel %vm485_vm8, 0, %v443_v24 }
  0xf8   : > { %461 = vst.msk [vmem:[%s284_s15 + $0x4] sm:$0xf] %vm459_vm6, %v902_v25  ;;  %559 = vrot.lane.b32.xlu1 %v496_v28, %s1007_s16  ;;  %519 = vrot.lane.b32.xlu0 %v486_v29, %s1008_s17 }
  0xfc   : > { %528 = vrot.lane.b32.xlu1 %v443_v24, %s1009_s18  ;;  %521 = vrot.lane.b32.xlu0 %v487_v26, %s1008_s17  ;;  %s279_s17 = scalar_lea.vmem %s1144_s5, %s899_s14 }
  0xfe   : > { %v611_v30 = vld [vmem:[#allocation2 + $0x40] sm:$0xff]  ;;  %v612_v40 = vld [vmem:[#allocation2 + $0x48] sm:$0xff] }
  0xff   : > { %911 = vmatprep.subr.bf16.mxu1 %v611_v30 }
 0x100   : > { %530 = vrot.lane.b32.xlu1 %v444_v21, %s1009_s18  ;;  %561 = vrot.lane.b32.xlu0 %v497_v27, %s1007_s16 }
 0x104   : > { %539 = vrot.lane.b32.xlu1 %v496_v28, %s1010_s19  ;;  %568 = vrot.lane.b32.xlu0 %v486_v29, %s1011_s20 }
 0x108   : > { %541 = vrot.lane.b32.xlu1 %v497_v27, %s1010_s19  ;;  %570 = vrot.lane.b32.xlu0 %v487_v26, %s1011_s20 }
 0x10c   : > { %548 = vrot.lane.b32.xlu1 %v486_v29, %s1012_s23  ;;  %577 = vrot.lane.b32.xlu0 %v443_v24, %s1013_s24 }
 0x110   : > { %550 = vrot.lane.b32.xlu1 %v487_v26, %s1012_s23  ;;  %579 = vrot.lane.b32.xlu0 %v444_v21, %s1013_s24 }
 0x114   : > { %588 = vrot.lane.b32.xlu1 %v497_v27, %s1014_s27  ;;  %586 = vrot.lane.b32.xlu0 %v496_v28, %s1014_s27 }
 0x16a   : > { %v560_v33 = vpop.permute.xlu1 %559  ;;  %v520_v34 = vpop.permute.xlu0 %519 }
 0x16b   : > { %566 = vst.msk [vmem:[#allocation2 + $0x50] sm:$0xff] %vm565_vm10, %v560_v33 }
 0x16c   : > { %526 = vst.msk [vmem:[#allocation2] sm:$0xff] %vm525_vm11, %v520_v34 }
 0x16e   : > { %v529_v35 = vpop.permute.xlu1 %528  ;;  %v522_v36 = vpop.permute.xlu0 %521 }
 0x16f   : > { %535 = vst.msk [vmem:[#allocation2 + $0x10] sm:$0xff] %vm534_vm12, %v529_v35 }
 0x170   : > { %527 = vst.msk [vmem:[#allocation2 + $0x8] sm:$0xff] %vm525_vm11, %v522_v36 }
 0x172   : > { %v531_v37 = vpop.permute.xlu1 %530  ;;  %v562_v38 = vpop.permute.xlu0 %561  ;;  %v613_v44 = vld [vmem:[#allocation2 + $0x50] sm:$0xff] }
 0x173   : > { %v603_v39 = vld [vmem:[#allocation2] sm:$0xff]  ;;  %536 = vst.msk [vmem:[#allocation2 + $0x18] sm:$0xff] %vm534_vm12, %v531_v37 }
 0x174   : > { %567 = vst.msk [vmem:[#allocation2 + $0x58] sm:$0xff] %vm565_vm10, %v562_v38  ;;  %912 = vmatpush3.bf16.msra.mxu1 %v603_v39 }
 0x175   : > { %913 = vmatprep.subr.bf16.mxu1 %v612_v40 }
 0x176   : > { %v540_v41 = vpop.permute.xlu1 %539  ;;  %v569_v42 = vpop.permute.xlu0 %568  ;;  %v605_v47 = vld [vmem:[#allocation2 + $0x10] sm:$0xff] }
 0x177   : > { %v604_v43 = vld [vmem:[#allocation2 + $0x8] sm:$0xff]  ;;  %546 = vst.msk [vmem:[#allocation2 + $0x20] sm:$0xff] %vm545_vm13, %v540_v41 }
 0x178   : > { %575 = vst.msk [vmem:[#allocation2 + $0x60] sm:$0xff] %vm574_vm14, %v569_v42  ;;  %914 = vmatpush3.bf16.msra.mxu1 %v604_v43 }
 0x179   : > { %915 = vmatprep.subr.bf16.mxu1 %v613_v44 }
 0x17a   : > { %v542_v45 = vpop.permute.xlu1 %541  ;;  %v571_v46 = vpop.permute.xlu0 %570  ;;  %v606_v51 = vld [vmem:[#allocation2 + $0x18] sm:$0xff] }
 0x17b   : > { %v614_v48 = vld [vmem:[#allocation2 + $0x58] sm:$0xff]  ;;  %547 = vst.msk [vmem:[#allocation2 + $0x28] sm:$0xff] %vm545_vm13, %v542_v45 }
 0x17c   : > { %576 = vst.msk [vmem:[#allocation2 + $0x68] sm:$0xff] %vm574_vm14, %v571_v46  ;;  %916 = vmatpush3.bf16.msra.mxu1 %v605_v47 }
 0x17d   : > { %917 = vmatprep.subr.bf16.mxu1 %v614_v48 }
 0x17e   : > { %v549_v49 = vpop.permute.xlu1 %548  ;;  %v578_v50 = vpop.permute.xlu0 %577  ;;  %v607_v55 = vld [vmem:[#allocation2 + $0x20] sm:$0xff] }
 0x17f   : > { %v615_v52 = vld [vmem:[#allocation2 + $0x60] sm:$0xff]  ;;  %555 = vst.msk [vmem:[#allocation2 + $0x30] sm:$0xff] %vm554_vm15, %v549_v49 }
 0x180   : > { %584 = vst.msk [vmem:[#allocation2 + $0x70] sm:$0xff] %vm583_vm0, %v578_v50  ;;  %918 = vmatpush3.bf16.msra.mxu1 %v606_v51 }
 0x181   : > { %919 = vmatprep.subr.bf16.mxu1 %v615_v52 }
 0x182   : > { %v551_v53 = vpop.permute.xlu1 %550  ;;  %v580_v54 = vpop.permute.xlu0 %579  ;;  %v608_v59 = vld [vmem:[#allocation2 + $0x28] sm:$0xff] }
 0x183   : > { %v616_v56 = vld [vmem:[#allocation2 + $0x68] sm:$0xff]  ;;  %556 = vst.msk [vmem:[#allocation2 + $0x38] sm:$0xff] %vm554_vm15, %v551_v53 }
 0x184   : > { %585 = vst.msk [vmem:[#allocation2 + $0x78] sm:$0xff] %vm583_vm0, %v580_v54  ;;  %920 = vmatpush3.bf16.msra.mxu1 %v607_v55 }
 0x185   : > { %921 = vmatprep.subr.bf16.mxu1 %v616_v56 }
 0x186   : > { %v589_v57 = vpop.permute.xlu1 %588  ;;  %v587_v58 = vpop.permute.xlu0 %586  ;;  %v609_v61 = vld [vmem:[#allocation2 + $0x30] sm:$0xff] }
 0x187   : > { %v617_v60 = vld [vmem:[#allocation2 + $0x70] sm:$0xff]  ;;  %594 = vst.msk [vmem:[#allocation2 + $0x88] sm:$0xff] %vm592_vm2, %v589_v57  ;;  %593 = vst.msk [vmem:[#allocation2 + $0x80] sm:$0xff] %vm592_vm2, %v587_v58 }
 0x188   : > { %922 = vmatpush3.bf16.msra.mxu1 %v608_v59 }
 0x189   : > { %923 = vmatprep.subr.bf16.mxu1 %v617_v60 }
 0x18a   : > { %v610_v63 = vld [vmem:[#allocation2 + $0x38] sm:$0xff] }
 0x18b   : > { %v618_v62 = vld [vmem:[#allocation2 + $0x78] sm:$0xff] }
 0x18c   : > { %924 = vmatpush3.bf16.msra.mxu1 %v609_v61 }
 0x18d   : > { %925 = vmatprep.subr.bf16.mxu1 %v618_v62 }
 0x18e   : > { %v619_v0 = vld [vmem:[#allocation2 + $0x80] sm:$0xff]  ;;  %v620_v3 = vld [vmem:[#allocation2 + $0x88] sm:$0xff] }
 0x18f   : > { %955 = vmatprep.subr.bf16.mxu0 %v619_v0 }
 0x190   : > { %926 = vmatpush3.bf16.msra.mxu1 %v610_v63  ;;  %956 = vmatpush3.bf16.msra.mxu0 %v619_v0 }
 0x191   : > { %957 = vmatprep.subr.bf16.mxu0 %v620_v3 }
 0x193   : > { %691 = vmatmul.mubr.bf16.vlgmr.msra.gmra.mrb[0].mxu1 %v990_v1 }
 0x194   : > { %698 = vmatprep.mubr.bf16.mxu1 %v995_v2  ;;  %958 = vmatpush3.bf16.msra.mxu0 %v620_v3 }
 0x197   : > { %960 = vmatmul.mubr.msk.bf16.vlgmr.msra.gmra.mrb[4].mxu0 %vm651_vm9, %v994_v4 }
 0x19b   : > { %699 = vmatmul.mubr.bf16.gmra.mrb[4].mxu1 %v997_v5 }
 0x266   : > { %v927_v6 = vpop.f32.mrb[0].mxu1 }
 0x267   : > { %v928_v7 = vpop.f32.mrb[1].mxu1 }
 0x268   : > { %v929_v8 = vadd.f32 %v928_v7, %v927_v6  ;;  %v930_v9 = vpop.f32.mrb[2].mxu1 }
 0x269   : > { %v931_v10 = vpop.f32.mrb[3].mxu1 }
 0x26a   : > { %v932_v11 = vadd.f32 %v931_v10, %v930_v9  ;;  %v961_v12 = vpop.f32.mrb[4].mxu0 }
 0x26b   : > { %v741_v13 = vpop.f32.mrb[5].mxu0 }
 0x26c   : > { %v742_v14 = vadd.f32 %v929_v8, %v741_v13  ;;  %v962_v15 = vpop.f32.mrb[6].mxu0 }
 0x26d   : > { %v744_v17 = vpop.f32.mrb[7].mxu0 }
 0x26e   : > { %v933_v16 = vpop.f32.mrb[4].mxu1  ;;  %756 = vst.msk [vmem:[%s279_s17] sm:$0xff] %vm498_vm1, %v742_v14  ;;  %v745_v18 = vadd.f32 %v932_v11, %v744_v17 }
 0x26f   : > { %v934_v19 = vpop.f32.mrb[5].mxu1 }
 0x270   : > { %v935_v20 = vadd.f32 %v934_v19, %v933_v16  ;;  %v936_v21 = vpop.f32.mrb[6].mxu1  ;;  %757 = vst.msk [vmem:[%s279_s17 + $0x8] sm:$0xff] %vm498_vm1, %v745_v18 }
 0x271   : > { %v937_v22 = vpop.f32.mrb[7].mxu1 }
 0x272   : > { %v750_v23 = vadd.f32 %v961_v12, %v935_v20  ;;  %v938_v24 = vadd.f32 %v937_v22, %v936_v21 }
 0x274   : > { %758 = vst.msk [vmem:[%s279_s17 + $0x10] sm:$0xff] %vm498_vm1, %v750_v23  ;;  %v753_v25 = vadd.f32 %v962_v15, %v938_v24 }
 0x276   : > { %759 = vst.msk [vmem:[%s279_s17 + $0x18] sm:$0xff] %vm498_vm1, %v753_v25 }
 0x277 PF: > { %s17_s21 = sadd.s32 1, %s1004_s21  }
 0x278   : > { %p14_p4 = scmp.ge.s32.totalorder %s17_s21, 4  }
 0x27a   :  { %16 = sbr.rel (!%p14_p4) target bundleno = 1 (0x1), region = 85 }

// kernel: fpn_forward.4
= control target key start
LH: loop header
LB: loop body
LE: loop exit
PB: predicated region body
PF: predicated region fallthrough
CT: control target
= control target key end

     0   :  { %s886_s15 = smov 0   ;;  %s978_s0 = inlined_call_operand.vmem [shape: bf16[2,64,4], index: 0, kind: input, shape index: {}]   ;;  %s979_s1 = inlined_call_operand.vmem [shape: bf16[32,64], index: 1, kind: input, shape index: {}]   ;;  %s980_s2 = inlined_call_operand.vmem [shape: bf16[32,288], index: 2, kind: input, shape index: {}]   ;;  %s981_s3 = inlined_call_operand.vmem [shape: f32[2,32,4], index: 3, kind: output, shape index: {0}]   ;;  %s982_s4 = inlined_call_operand.vmem [shape: bf16[2,32,4], index: 4, kind: output, shape index: {1}]  }
   0x1 LB: > { %s719_s16 = sadd.s32 4294967295, %s852_s15   ;;  %p723_p0 = scmp.ge.s32.totalorder %s852_s15, 1  ;;  %s852_s15 = sphi %s886_s15, %s15_s15  }
   0x2   : > { %p165_p1 = scmp.lt.s32.totalorder %s852_s15, 3 }
   0x4   : > { %p166_p2 = pnand %p723_p0, %p165_p1 }
   0x5   : > { %p196_p3 = scmp.lt.s32.totalorder (!%p166_p2), %s719_s16, 1  ;;  %v836_v0 = vld [vmem:[%s979_s1] sm:$0xff] (!%p166_p2)   ;;  %vm260_vm0 = vcmask (!%p166_p2), 523264   ;;  %v837_v5 = vld [vmem:[%s979_s1 + $0x8] sm:$0xff] (!%p166_p2)   ;;  %vm371_vm1 = vcmask (!%p166_p2), 31744   ;;  %v854_v6 = vmov (!%p166_p2), 0   ;;  %v337_v7 = vlaneseq (!%p166_p2) }
   0x6   : > { %169 = sbr.rel (%p166_p2) target bundleno = 634 (0x27a), region = 32  ;;  %805 = vmatprep.mubr.msk.bf16.mxu0 (!%p166_p2), %vm260_vm0, %v836_v0  ;;  %381 = vst.msk [vmem:[#allocation2 + $0x48] sm:$0xff] (!%p166_p2), %vm371_vm1, %v854_v6  ;;  %372 = vst.msk [vmem:[#allocation2] sm:$0xff] (!%p166_p2), %vm371_vm1, %v854_v6  ;;  %vm332_vm6 = vcmask (!%p166_p2), 27648   ;;  %s855_s29 = smov (!%p166_p2), 127   ;;  %vm522_vm9 = vcmask (!%p166_p2), 261120  }
   0x7   : > { %373 = vst.msk [vmem:[#allocation2 + $0x8] sm:$0xff] (!%p166_p2), %vm371_vm1, %v854_v6  ;;  %374 = vst.msk [vmem:[#allocation2 + $0x10] sm:$0xff] (!%p166_p2), %vm371_vm1, %v854_v6  ;;  %v338_v8 = vand.u32 (!%p166_p2), 127, %v337_v7  ;;  %v355_v10 = vshrl.u32 (!%p166_p2), %v337_v7, 7  ;;  %s856_s30 = smov (!%p166_p2), 3   ;;  %s857_s5 = smov (!%p166_p2), 2  }
   0x8   : > { %375 = vst.msk [vmem:[#allocation2 + $0x18] sm:$0xff] (!%p166_p2), %vm371_vm1, %v854_v6  ;;  %376 = vst.msk [vmem:[#allocation2 + $0x20] sm:$0xff] (!%p166_p2), %vm371_vm1, %v854_v6  ;;  %s858_s6 = smov (!%p166_p2), 1   ;;  %s859_s7 = smov (!%p166_p2), 126   ;;  %v840_v31 = vld [vmem:[%s980_s2 + $0x4] ss:$12 sps:$4 sm:$0xff] (!%p166_p2)  }
   0x9   : > { %377 = vst.msk [vmem:[#allocation2 + $0x28] sm:$0xff] (!%p166_p2), %vm371_vm1, %v854_v6  ;;  %378 = vst.msk [vmem:[#allocation2 + $0x30] sm:$0xff] (!%p166_p2), %vm371_vm1, %v854_v6  ;;  %v343_v9 = vand.u32 (!%p166_p2), 1, %v338_v8  ;;  %v356_v11 = vsub.s32 (!%p166_p2), 0, %v355_v10  ;;  %561 = vmatprep.mubr.bf16.mxu1 (!%p166_p2), %v840_v31  ;;  %s860_s10 = smov (!%p166_p2), 125   ;;  %vm437_vm10 = vcmask (!%p166_p2), 23552  }
   0xa   : > { %379 = vst.msk [vmem:[#allocation2 + $0x38] sm:$0xff] (!%p166_p2), %vm371_vm1, %v854_v6  ;;  %380 = vst.msk [vmem:[#allocation2 + $0x40] sm:$0xff] (!%p166_p2), %vm371_vm1, %v854_v6  ;;  %v841_v32 = vld [vmem:[%s980_s2 + $0x8] ss:$12 sps:$4 sm:$0xff] (!%p166_p2)   ;;  %vm398_vm11 = vcmask (!%p166_p2), 31768   ;;  %vm407_vm12 = vcmask (!%p166_p2), 31760  }
   0xb   : > { %382 = vst.msk [vmem:[#allocation2 + $0x50] sm:$0xff] (!%p166_p2), %vm371_vm1, %v854_v6  ;;  %383 = vst.msk [vmem:[#allocation2 + $0x58] sm:$0xff] (!%p166_p2), %vm371_vm1, %v854_v6  ;;  %vm361_vm2 = vcmp.eq.s32.totalorder (!%p166_p2), %v343_v9, 0  ;;  %vm351_vm3 = vcmp.eq.s32.totalorder (!%p166_p2), %v343_v9, 1  ;;  %vm418_vm13 = vcmask (!%p166_p2), 31752   ;;  %vm454_vm14 = vcmask (!%p166_p2), 15360  }
   0xc   : > { %384 = vst.msk [vmem:[#allocation2 + $0x60] sm:$0xff] (!%p166_p2), %vm371_vm1, %v854_v6  ;;  %385 = vst.msk [vmem:[#allocation2 + $0x68] sm:$0xff] (!%p166_p2), %vm371_vm1, %v854_v6  ;;  %vm463_vm15 = vcmask (!%p166_p2), 7168  }
   0xd   : > { %s984_s16 = smov (!%p196_p3, %s719_s16), 1  ;;  %386 = vst.msk [vmem:[#allocation2 + $0x70] sm:$0xff] %vm371_vm1, %v854_v6  ;;  %387 = vst.msk [vmem:[#allocation2 + $0x78] sm:$0xff] %vm371_vm1, %v854_v6 }
   0xe   : > { %s752_s19 = sshll.u32 %s984_s16, 5  ;;  %388 = vst.msk [vmem:[#allocation2 + $0x80] sm:$0xff] %vm371_vm1, %v854_v6  ;;  %389 = vst.msk [vmem:[#allocation2 + $0x88] sm:$0xff] %vm371_vm1, %v854_v6  ;;  %s754_s25 = sshll.u32 %s984_s16, 4 }
   0xf   : > { %s200_s22 = scalar_lea.vmem %s978_s0, %s752_s19  ;;  %vm362_vm4 = vmpackc.low %vm361_vm2, %vm361_vm2  ;;  %s210_s28 = scalar_lea.vmem %s982_s4, %s754_s25 }
  0x10   : > { %v832_v1 = vld [vmem:[%s200_s22] sm:$0xff]   ;;  %v833_v2 = vld [vmem:[%s200_s22 + $0x8] sm:$0xff]   ;;  %v834_v3 = vld [vmem:[%s200_s22 + $0x10] sm:$0xff]   ;;  %v363_v12 = vsel %vm362_vm4, 65537, %v854_v6  ;;  %s205_s26 = scalar_lea.vmem %s981_s3, %s752_s19 }
  0x11   : > { %797 = vmatprep.subr.bf16.mxu0 %v832_v1  ;;  %v835_v4 = vld [vmem:[%s200_s22 + $0x18] sm:$0xff]   ;;  %vm352_vm5 = vmpackc.low %vm351_vm3, %vm351_vm3  ;;  %v367_v14 = vrot.slane %v363_v12, %v356_v11 }
  0x12   : > { %798 = vmatpush3.bf16.msra.mxu0 %v832_v1  ;;  %v353_v13 = vsel %vm352_vm5, 65537, %v854_v6  ;;  %v838_v1 = vld [vmem:[%s980_s2] ss:$12 sps:$4 sm:$0xff]  }
  0x13   : > { %799 = vmatprep.subr.bf16.mxu0 %v833_v2  ;;  %v357_v15 = vrot.slane %v353_v13, %v356_v11  ;;  %vm368_vm7 = vcmp.ne.s16.totalorder %v367_v14, 0 }
  0x15   : > { %vm358_vm8 = vcmp.ne.s16.totalorder %v357_v15, 0 }
  0x16   : > { %800 = vmatpush3.bf16.msra.mxu0 %v833_v2  ;;  %v843_v2 = vld [vmem:[%s980_s2 + $0x1c] ss:$12 sps:$4 sm:$0xff]  }
  0x17   : > { %801 = vmatprep.subr.bf16.mxu0 %v834_v3 }
  0x1a   : > { %802 = vmatpush3.bf16.msra.mxu0 %v834_v3 }
  0x1b   : > { %803 = vmatprep.subr.bf16.mxu0 %v835_v4 }
  0x1e   : > { %804 = vmatpush3.bf16.msra.mxu0 %v835_v4  ;;  %v842_v4 = vld [vmem:[%s980_s2 + $0x20] ss:$12 sps:$4 sm:$0xff]  }
  0x21   : > { %806 = vmatmul.mubr.msk.bf16.vlgmr.msra.gmra.mrb[0].mxu0 %vm260_vm0, %v837_v5  ;;  %v845_v5 = vld [vmem:[%s980_s2 + $0x18] ss:$12 sps:$4 sm:$0xff]  }
  0x22   : > { %813 = vmatprep.mubr.msk.bf16.mxu0 %vm522_vm9, %v841_v32 }
  0xf4   : > { %v807_v16 = vpop.f32.mrb[0].mxu0 }
  0xf5   : > { %v757_v17 = vpack.c.bf16 %v807_v16, %v807_v16  ;;  %v301_v18 = vpop.f32.mrb[1].mxu0 }
  0xf6   : > { %v755_v19 = vpack.c.bf16 %v301_v18, %v301_v18  ;;  %v808_v20 = vpop.f32.mrb[2].mxu0 }
  0xf7   : > { %335 = vst.msk [vmem:[%s210_s28 + $0x8] sm:$0xf] %vm332_vm6, %v757_v17  ;;  %v317_v21 = vpack.c.bf16 %v808_v20, %v807_v16  ;;  %v758_v22 = vpack.c.bf16 %v808_v20, %v808_v20  ;;  %v304_v23 = vpop.f32.mrb[3].mxu0 }
  0xf8   : > { %333 = vst.msk [vmem:[%s210_s28] sm:$0xf] %vm332_vm6, %v755_v19  ;;  %v316_v24 = vpack.c.bf16 %v304_v23, %v301_v18  ;;  %v756_v25 = vpack.c.bf16 %v304_v23, %v304_v23 }
  0xf9   : > { %336 = vst.msk [vmem:[%s210_s28 + $0xc] sm:$0xf] %vm332_vm6, %v758_v22  ;;  %v360_v26 = vsel %vm358_vm8, 0, %v317_v21  ;;  %v370_v27 = vsel %vm368_vm7, 0, %v317_v21 }
  0xfa   : > { %430 = vst.msk [vmem:[#allocation2 + $0x48] sm:$0xff] %vm371_vm1, %v317_v21  ;;  %429 = vst.msk [vmem:[#allocation2 + $0x40] sm:$0xff] %vm371_vm1, %v316_v24  ;;  %v369_v28 = vsel %vm368_vm7, 0, %v316_v24  ;;  %v359_v29 = vsel %vm358_vm8, 0, %v316_v24 }
  0xfb   : > { %334 = vst.msk [vmem:[%s210_s28 + $0x4] sm:$0xf] %vm332_vm6, %v756_v25  ;;  %431 = vrot.lane.b32.xlu1 %v369_v28, %s855_s29  ;;  %392 = vrot.lane.b32.xlu0 %v359_v29, %s856_s30 }
  0xff   : > { %401 = vrot.lane.b32.xlu1 %v316_v24, %s857_s5  ;;  %394 = vrot.lane.b32.xlu0 %v360_v26, %s856_s30 }
 0x101   : > { %v482_v30 = vld [vmem:[#allocation2 + $0x40] sm:$0xff]  ;;  %v483_v40 = vld [vmem:[#allocation2 + $0x48] sm:$0xff] }
 0x102   : > { %765 = vmatprep.subr.bf16.mxu1 %v482_v30 }
 0x103   : > { %403 = vrot.lane.b32.xlu1 %v317_v21, %s857_s5  ;;  %433 = vrot.lane.b32.xlu0 %v370_v27, %s855_s29 }
 0x107   : > { %412 = vrot.lane.b32.xlu1 %v369_v28, %s858_s6  ;;  %440 = vrot.lane.b32.xlu0 %v359_v29, %s855_s29 }
 0x10b   : > { %414 = vrot.lane.b32.xlu1 %v370_v27, %s858_s6  ;;  %442 = vrot.lane.b32.xlu0 %v360_v26, %s855_s29 }
 0x10f   : > { %421 = vrot.lane.b32.xlu1 %v359_v29, %s858_s6  ;;  %448 = vrot.lane.b32.xlu0 %v316_v24, %s859_s7 }
 0x113   : > { %423 = vrot.lane.b32.xlu1 %v360_v26, %s858_s6  ;;  %450 = vrot.lane.b32.xlu0 %v317_v21, %s859_s7 }
 0x117   : > { %459 = vrot.lane.b32.xlu1 %v370_v27, %s860_s10  ;;  %457 = vrot.lane.b32.xlu0 %v369_v28, %s860_s10 }
 0x16d   : > { %v432_v33 = vpop.permute.xlu1 %431  ;;  %v393_v34 = vpop.permute.xlu0 %392 }
 0x16e   : > { %438 = vst.msk [vmem:[#allocation2 + $0x50] sm:$0xff] %vm437_vm10, %v432_v33 }
 0x16f   : > { %399 = vst.msk [vmem:[#allocation2] sm:$0xff] %vm398_vm11, %v393_v34 }
 0x171   : > { %v402_v35 = vpop.permute.xlu1 %401  ;;  %v395_v36 = vpop.permute.xlu0 %394 }
 0x172   : > { %408 = vst.msk [vmem:[#allocation2 + $0x10] sm:$0xff] %vm407_vm12, %v402_v35 }
 0x173   : > { %400 = vst.msk [vmem:[#allocation2 + $0x8] sm:$0xff] %vm398_vm11, %v395_v36 }
 0x175   : > { %v404_v37 = vpop.permute.xlu1 %403  ;;  %v434_v38 = vpop.permute.xlu0 %433  ;;  %v484_v44 = vld [vmem:[#allocation2 + $0x50] sm:$0xff] }
 0x176   : > { %v474_v39 = vld [vmem:[#allocation2] sm:$0xff]  ;;  %409 = vst.msk [vmem:[#allocation2 + $0x18] sm:$0xff] %vm407_vm12, %v404_v37 }
 0x177   : > { %439 = vst.msk [vmem:[#allocation2 + $0x58] sm:$0xff] %vm437_vm10, %v434_v38  ;;  %766 = vmatpush3.bf16.msra.mxu1 %v474_v39 }
 0x178   : > { %767 = vmatprep.subr.bf16.mxu1 %v483_v40 }
 0x179   : > { %v413_v41 = vpop.permute.xlu1 %412  ;;  %v441_v42 = vpop.permute.xlu0 %440  ;;  %v476_v47 = vld [vmem:[#allocation2 + $0x10] sm:$0xff] }
 0x17a   : > { %v475_v43 = vld [vmem:[#allocation2 + $0x8] sm:$0xff]  ;;  %419 = vst.msk [vmem:[#allocation2 + $0x20] sm:$0xff] %vm418_vm13, %v413_v41 }
 0x17b   : > { %446 = vst.msk [vmem:[#allocation2 + $0x60] sm:$0xff] %vm437_vm10, %v441_v42  ;;  %768 = vmatpush3.bf16.msra.mxu1 %v475_v43 }
 0x17c   : > { %769 = vmatprep.subr.bf16.mxu1 %v484_v44 }
 0x17d   : > { %v415_v45 = vpop.permute.xlu1 %414  ;;  %v443_v46 = vpop.permute.xlu0 %442  ;;  %v477_v51 = vld [vmem:[#allocation2 + $0x18] sm:$0xff] }
 0x17e   : > { %v485_v48 = vld [vmem:[#allocation2 + $0x58] sm:$0xff]  ;;  %420 = vst.msk [vmem:[#allocation2 + $0x28] sm:$0xff] %vm418_vm13, %v415_v45 }
 0x17f   : > { %447 = vst.msk [vmem:[#allocation2 + $0x68] sm:$0xff] %vm437_vm10, %v443_v46  ;;  %770 = vmatpush3.bf16.msra.mxu1 %v476_v47 }
 0x180   : > { %771 = vmatprep.subr.bf16.mxu1 %v485_v48 }
 0x181   : > { %v422_v49 = vpop.permute.xlu1 %421  ;;  %v449_v50 = vpop.permute.xlu0 %448  ;;  %v478_v55 = vld [vmem:[#allocation2 + $0x20] sm:$0xff] }
 0x182   : > { %v486_v52 = vld [vmem:[#allocation2 + $0x60] sm:$0xff]  ;;  %427 = vst.msk [vmem:[#allocation2 + $0x30] sm:$0xff] %vm418_vm13, %v422_v49 }
 0x183   : > { %455 = vst.msk [vmem:[#allocation2 + $0x70] sm:$0xff] %vm454_vm14, %v449_v50  ;;  %772 = vmatpush3.bf16.msra.mxu1 %v477_v51 }
 0x184   : > { %773 = vmatprep.subr.bf16.mxu1 %v486_v52 }
 0x185   : > { %v424_v53 = vpop.permute.xlu1 %423  ;;  %v451_v54 = vpop.permute.xlu0 %450  ;;  %v479_v59 = vld [vmem:[#allocation2 + $0x28] sm:$0xff] }
 0x186   : > { %v487_v56 = vld [vmem:[#allocation2 + $0x68] sm:$0xff]  ;;  %428 = vst.msk [vmem:[#allocation2 + $0x38] sm:$0xff] %vm418_vm13, %v424_v53 }
 0x187   : > { %456 = vst.msk [vmem:[#allocation2 + $0x78] sm:$0xff] %vm454_vm14, %v451_v54  ;;  %774 = vmatpush3.bf16.msra.mxu1 %v478_v55 }
 0x188   : > { %775 = vmatprep.subr.bf16.mxu1 %v487_v56 }
 0x189   : > { %v460_v57 = vpop.permute.xlu1 %459  ;;  %v458_v58 = vpop.permute.xlu0 %457  ;;  %v480_v61 = vld [vmem:[#allocation2 + $0x30] sm:$0xff] }
 0x18a   : > { %v488_v60 = vld [vmem:[#allocation2 + $0x70] sm:$0xff]  ;;  %465 = vst.msk [vmem:[#allocation2 + $0x88] sm:$0xff] %vm463_vm15, %v460_v57  ;;  %464 = vst.msk [vmem:[#allocation2 + $0x80] sm:$0xff] %vm463_vm15, %v458_v58 }
 0x18b   : > { %776 = vmatpush3.bf16.msra.mxu1 %v479_v59 }
 0x18c   : > { %777 = vmatprep.subr.bf16.mxu1 %v488_v60 }
 0x18d   : > { %v481_v63 = vld [vmem:[#allocation2 + $0x38] sm:$0xff] }
 0x18e   : > { %v489_v62 = vld [vmem:[#allocation2 + $0x78] sm:$0xff] }
 0x18f   : > { %778 = vmatpush3.bf16.msra.mxu1 %v480_v61 }
 0x190   : > { %779 = vmatprep.subr.bf16.mxu1 %v489_v62 }
 0x191   : > { %v490_v0 = vld [vmem:[#allocation2 + $0x80] sm:$0xff]  ;;  %v491_v3 = vld [vmem:[#allocation2 + $0x88] sm:$0xff] }
 0x192   : > { %809 = vmatprep.subr.bf16.mxu0 %v490_v0 }
 0x193   : > { %780 = vmatpush3.bf16.msra.mxu1 %v481_v63  ;;  %810 = vmatpush3.bf16.msra.mxu0 %v490_v0 }
 0x194   : > { %811 = vmatprep.subr.bf16.mxu0 %v491_v3 }
 0x196   : > { %562 = vmatmul.mubr.bf16.vlgmr.msra.gmra.mrb[0].mxu1 %v838_v1 }
 0x197   : > { %569 = vmatprep.mubr.bf16.mxu1 %v843_v2  ;;  %812 = vmatpush3.bf16.msra.mxu0 %v491_v3 }
 0x19a   : > { %814 = vmatmul.mubr.msk.bf16.vlgmr.msra.gmra.mrb[4].mxu0 %vm522_vm9, %v842_v4 }
 0x19e   : > { %570 = vmatmul.mubr.bf16.gmra.mrb[4].mxu1 %v845_v5 }
 0x269   : > { %v781_v6 = vpop.f32.mrb[0].mxu1 }
 0x26a   : > { %v782_v7 = vpop.f32.mrb[1].mxu1 }
 0x26b   : > { %v783_v8 = vadd.f32 %v782_v7, %v781_v6  ;;  %v784_v9 = vpop.f32.mrb[2].mxu1 }
 0x26c   : > { %v785_v10 = vpop.f32.mrb[3].mxu1 }
 0x26d   : > { %v786_v11 = vadd.f32 %v785_v10, %v784_v9  ;;  %v815_v12 = vpop.f32.mrb[4].mxu0 }
 0x26e   : > { %v612_v13 = vpop.f32.mrb[5].mxu0 }
 0x26f   : > { %v613_v14 = vadd.f32 %v783_v8, %v612_v13  ;;  %v816_v15 = vpop.f32.mrb[6].mxu0 }
 0x270   : > { %v615_v17 = vpop.f32.mrb[7].mxu0 }
 0x271   : > { %v787_v16 = vpop.f32.mrb[4].mxu1  ;;  %627 = vst.msk [vmem:[%s205_s26] sm:$0xff] %vm371_vm1, %v613_v14  ;;  %v616_v18 = vadd.f32 %v786_v11, %v615_v17 }
 0x272   : > { %v788_v19 = vpop.f32.mrb[5].mxu1 }
 0x273   : > { %v789_v20 = vadd.f32 %v788_v19, %v787_v16  ;;  %v790_v21 = vpop.f32.mrb[6].mxu1  ;;  %628 = vst.msk [vmem:[%s205_s26 + $0x8] sm:$0xff] %vm371_vm1, %v616_v18 }
 0x274   : > { %v791_v22 = vpop.f32.mrb[7].mxu1 }
 0x275   : > { %v621_v23 = vadd.f32 %v815_v12, %v789_v20  ;;  %v792_v24 = vadd.f32 %v791_v22, %v790_v21 }
 0x277   : > { %629 = vst.msk [vmem:[%s205_s26 + $0x10] sm:$0xff] %vm371_vm1, %v621_v23  ;;  %v624_v25 = vadd.f32 %v816_v15, %v792_v24 }
 0x279   : > { %630 = vst.msk [vmem:[%s205_s26 + $0x18] sm:$0xff] %vm371_vm1, %v624_v25 }
 0x27a PF: > { %s15_s15 = sadd.s32 1, %s852_s15  }
 0x27b   : > { %p12_p4 = scmp.ge.s32.totalorder %s15_s15, 4  }
 0x27d   :  { %14 = sbr.rel (!%p12_p4) target bundleno = 1 (0x1), region = 74 }

// kernel: fpn_forward.5
= control target key start
LH: loop header
LB: loop body
LE: loop exit
PB: predicated region body
PF: predicated region fallthrough
CT: control target
= control target key end

     0   :  { %s1059_s21 = smov 0   ;;  %s1150_s0 = inlined_call_operand.vmem [shape: bf16[2,32,16], index: 0, kind: input, shape index: {}]   ;;  %s1151_s1 = inlined_call_operand.vmem [shape: bf16[2,32,4], index: 1, kind: input, shape index: {}]   ;;  %s1152_s2 = inlined_call_operand.vmem [shape: bf16[4,16], index: 2, kind: input, shape index: {}]   ;;  %s1153_s3 = inlined_call_operand.vmem [shape: bf16[32,32], index: 3, kind: input, shape index: {}]   ;;  %s1154_s4 = inlined_call_operand.vmem [shape: bf16[32,288], index: 4, kind: input, shape index: {}]   ;;  %s1155_s5 = inlined_call_operand.vmem [shape: f32[2,32,16], index: 5, kind: output, shape index: {0}]   ;;  %s1156_s6 = inlined_call_operand.vmem [shape: bf16[2,32,16], index: 6, kind: output, shape index: {1}]  }
   0x1 LB: > { %s865_s22 = sadd.s32 4294967295, %s1013_s21   ;;  %p869_p0 = scmp.ge.s32.totalorder %s1013_s21, 1  ;;  %s1013_s21 = sphi %s1059_s21, %s17_s21  }
   0x2   : > { %p225_p1 = scmp.lt.s32.totalorder %s1013_s21, 3 }
   0x4   : > { %p226_p2 = pnand %p869_p0, %p225_p1 }
   0x5   : > { %v300_v0 = vld [vmem:[%s1152_s2] sm:$0x3] (!%p226_p2)  ;;  %vm318_vm0 = vcmask (!%p226_p2), 1041408   ;;  %p265_p3 = scmp.lt.s32.totalorder (!%p226_p2), %s865_s22, 1  ;;  %vm311_vm1 = vcmask (!%p226_p2), 31744   ;;  %vm393_vm2 = vcmask (!%p226_p2), 261120   ;;  %v470_v9 = vlaneseq (!%p226_p2) }
   0x6   : > { %229 = sbr.rel (%p226_p2) target bundleno = 631 (0x277), region = 40  ;;  %975 = vmatprep.subr.msk.bf16.mxu0 (!%p226_p2), %vm318_vm0, %v300_v0  ;;  %v320_v1 = vsel (!%p226_p2), %vm318_vm0, %v300_v0, 0  ;;  %v997_v2 = vld [vmem:[%s1153_s3] sm:$0xff] (!%p226_p2)   ;;  %v998_v7 = vld [vmem:[%s1153_s3 + $0x8] sm:$0xff] (!%p226_p2)   ;;  %vm504_vm3 = vcmask (!%p226_p2), 130048   ;;  %v1015_v8 = vmov (!%p226_p2), 0  }
   0x7   : > { %950 = vmatpush3.bf16.msra.mxu0 (!%p226_p2), %v320_v1  ;;  %514 = vst.msk [vmem:[#allocation2 + $0x48] sm:$0xff] (!%p226_p2), %vm504_vm3, %v1015_v8  ;;  %505 = vst.msk [vmem:[#allocation2] sm:$0xff] (!%p226_p2), %vm504_vm3, %v1015_v8  ;;  %v471_v10 = vand.u32 (!%p226_p2), 127, %v470_v9  ;;  %v488_v12 = vshrl.u32 (!%p226_p2), %v470_v9, 7  ;;  %vm465_vm8 = vcmask (!%p226_p2), 125952   ;;  %s1016_s15 = smov (!%p226_p2), 127  }
   0x8   : > { %506 = vst.msk [vmem:[#allocation2 + $0x8] sm:$0xff] (!%p226_p2), %vm504_vm3, %v1015_v8  ;;  %507 = vst.msk [vmem:[#allocation2 + $0x10] sm:$0xff] (!%p226_p2), %vm504_vm3, %v1015_v8  ;;  %s1017_s16 = smov (!%p226_p2), 5   ;;  %s1018_s17 = smov (!%p226_p2), 4   ;;  %v1001_v33 = vld [vmem:[%s1154_s4 + $0x4] ss:$12 sps:$4 sm:$0xff] (!%p226_p2)  }
   0x9   : > { %508 = vst.msk [vmem:[#allocation2 + $0x18] sm:$0xff] (!%p226_p2), %vm504_vm3, %v1015_v8  ;;  %509 = vst.msk [vmem:[#allocation2 + $0x20] sm:$0xff] (!%p226_p2), %vm504_vm3, %v1015_v8  ;;  %v476_v11 = vand.u32 (!%p226_p2), 3, %v471_v10  ;;  %v489_v13 = vsub.s32 (!%p226_p2), 0, %v488_v12  ;;  %s1019_s18 = smov (!%p226_p2), 3   ;;  %s1020_s19 = smov (!%p226_p2), 125   ;;  %695 = vmatprep.mubr.bf16.mxu1 (!%p226_p2), %v1001_v33 }
   0xa   : > { %510 = vst.msk [vmem:[#allocation2 + $0x28] sm:$0xff] (!%p226_p2), %vm504_vm3, %v1015_v8  ;;  %511 = vst.msk [vmem:[#allocation2 + $0x30] sm:$0xff] (!%p226_p2), %vm504_vm3, %v1015_v8  ;;  %s1021_s20 = smov (!%p226_p2), 1   ;;  %s1022_s23 = smov (!%p226_p2), 124   ;;  %v1002_v34 = vld [vmem:[%s1154_s4 + $0x8] ss:$12 sps:$4 sm:$0xff] (!%p226_p2)  }
   0xb   : > { %512 = vst.msk [vmem:[#allocation2 + $0x38] sm:$0xff] (!%p226_p2), %vm504_vm3, %v1015_v8  ;;  %513 = vst.msk [vmem:[#allocation2 + $0x40] sm:$0xff] (!%p226_p2), %vm504_vm3, %v1015_v8  ;;  %vm494_vm4 = vcmp.eq.s32.totalorder (!%p226_p2), %v476_v11, 0  ;;  %vm484_vm5 = vcmp.eq.s32.totalorder (!%p226_p2), %v476_v11, 3  ;;  %s1023_s26 = smov (!%p226_p2), 123   ;;  %vm571_vm11 = vcmask (!%p226_p2), 121856  }
   0xc   : > { %515 = vst.msk [vmem:[#allocation2 + $0x50] sm:$0xff] (!%p226_p2), %vm504_vm3, %v1015_v8  ;;  %516 = vst.msk [vmem:[#allocation2 + $0x58] sm:$0xff] (!%p226_p2), %vm504_vm3, %v1015_v8  ;;  %vm531_vm12 = vcmask (!%p226_p2), 130088   ;;  %vm540_vm13 = vcmask (!%p226_p2), 130080   ;;  %vm551_vm14 = vcmask (!%p226_p2), 130072   ;;  %vm580_vm15 = vcmask (!%p226_p2), 105472  }
   0xd   : > { %s1158_s22 = smov (!%p265_p3, %s865_s22), 1  ;;  %517 = vst.msk [vmem:[#allocation2 + $0x60] sm:$0xff] %vm504_vm3, %v1015_v8  ;;  %518 = vst.msk [vmem:[#allocation2 + $0x68] sm:$0xff] %vm504_vm3, %v1015_v8  ;;  %vm560_vm0 = vcmask 130056  }
   0xe   : > { %s1073_s25 = sshll.u32 %s1158_s22, 4  ;;  %519 = vst.msk [vmem:[#allocation2 + $0x70] sm:$0xff] %vm504_vm3, %v1015_v8  ;;  %520 = vst.msk [vmem:[#allocation2 + $0x78] sm:$0xff] %vm504_vm3, %v1015_v8  ;;  %s904_s13 = sshll.u32 %s1158_s22, 5 }
   0xf   : > { %s274_s28 = scalar_lea.vmem %s1151_s1, %s1073_s25  ;;  %s269_s7 = scalar_lea.vmem %s1150_s0, %s1073_s25  ;;  %521 = vst.msk [vmem:[#allocation2 + $0x80] sm:$0xff] %vm504_vm3, %v1015_v8  ;;  %522 = vst.msk [vmem:[#allocation2 + $0x88] sm:$0xff] %vm504_vm3, %v1015_v8 }
  0x10   : > { %v993_v3 = vld [vmem:[%s274_s28] sm:$0xff]   ;;  %v995_v5 = vld [vmem:[%s274_s28 + $0x8] sm:$0xff]   ;;  %vm495_vm6 = vmpackc.low %vm494_vm4, %vm494_vm4  ;;  %s284_s14 = scalar_lea.vmem %s1156_s6, %s1073_s25  ;;  %vm598_vm4 = vcmask 89088  }
  0x11   : > { %v994_v4 = vld [vmem:[%s269_s7] sm:$0xff]   ;;  %951 = vmatprep.mubr.msk.bf16.mxu0 %vm311_vm1, %v993_v3  ;;  %v996_v6 = vld [vmem:[%s269_s7 + $0x8] sm:$0xff]   ;;  %vm485_vm7 = vmpackc.low %vm484_vm5, %vm484_vm5  ;;  %v496_v14 = vsel %vm495_vm6, 65537, %v1015_v8 }
  0x12   : > { %955 = vmatprep.subr.bf16.mxu0 %v994_v4  ;;  %952 = vmatmul.mubr.msk.bf16.vlgmr.msra.gmra.mrb[0].mxu0 %vm311_vm1, %v995_v5  ;;  %v486_v15 = vsel %vm485_vm7, 65537, %v1015_v8  ;;  %v500_v16 = vrot.slane %v496_v14, %v489_v13  ;;  %vm589_vm1 = vcmask 97280   ;;  %v999_v3 = vld [vmem:[%s1154_s4] ss:$12 sps:$4 sm:$0xff]  }
  0x13   : > { %956 = vmatpush3.bf16.msra.mxu0 %v994_v4  ;;  %959 = vmatprep.mubr.msk.bf16.mxu0 %vm393_vm2, %v997_v2  ;;  %v490_v17 = vrot.slane %v486_v15, %v489_v13  ;;  %v1004_v4 = vld [vmem:[%s1154_s4 + $0x1c] ss:$12 sps:$4 sm:$0xff]  }
  0x14   : > { %957 = vmatprep.subr.bf16.mxu0 %v996_v6  ;;  %vm501_vm9 = vcmp.ne.s16.totalorder %v500_v16, 0 }
  0x15   : > { %vm491_vm10 = vcmp.ne.s16.totalorder %v490_v17, 0 }
  0x17   : > { %958 = vmatpush3.bf16.msra.mxu0 %v996_v6  ;;  %v1003_v6 = vld [vmem:[%s1154_s4 + $0x20] ss:$12 sps:$4 sm:$0xff]  }
  0x1e   : > { %960 = vmatmul.mubr.msk.bf16.vlgmr.msra.gmra.mrb[0].mxu0 %vm393_vm2, %v998_v7  ;;  %v1006_v7 = vld [vmem:[%s1154_s4 + $0x18] ss:$12 sps:$4 sm:$0xff]  }
  0x1f   : > { %967 = vmatprep.mubr.msk.bf16.mxu0 %vm393_vm2, %v1002_v34 }
  0xf1   : > { %v961_v18 = vpop.f32.mrb[0].mxu0 }
  0xf2   : > { %v908_v19 = vpack.c.bf16 %v961_v18, %v961_v18  ;;  %v434_v20 = vpop.f32.mrb[1].mxu0 }
  0xf3   : > { %v906_v21 = vpack.c.bf16 %v434_v20, %v434_v20  ;;  %v962_v22 = vpop.f32.mrb[2].mxu0 }
  0xf4   : > { %468 = vst.msk [vmem:[%s284_s14 + $0x8] sm:$0xf] %vm465_vm8, %v908_v19  ;;  %v450_v23 = vpack.c.bf16 %v962_v22, %v961_v18  ;;  %v909_v24 = vpack.c.bf16 %v962_v22, %v962_v22  ;;  %v437_v25 = vpop.f32.mrb[3].mxu0 }
  0xf5   : > { %466 = vst.msk [vmem:[%s284_s14] sm:$0xf] %vm465_vm8, %v906_v21  ;;  %v449_v26 = vpack.c.bf16 %v437_v25, %v434_v20  ;;  %v907_v27 = vpack.c.bf16 %v437_v25, %v437_v25 }
  0xf6   : > { %469 = vst.msk [vmem:[%s284_s14 + $0xc] sm:$0xf] %vm465_vm8, %v909_v24  ;;  %v493_v28 = vsel %vm491_vm10, 0, %v450_v23  ;;  %v503_v29 = vsel %vm501_vm9, 0, %v450_v23 }
  0xf7   : > { %564 = vst.msk [vmem:[#allocation2 + $0x48] sm:$0xff] %vm504_vm3, %v450_v23  ;;  %563 = vst.msk [vmem:[#allocation2 + $0x40] sm:$0xff] %vm504_vm3, %v449_v26  ;;  %v502_v30 = vsel %vm501_vm9, 0, %v449_v26  ;;  %v492_v31 = vsel %vm491_vm10, 0, %v449_v26 }
  0xf8   : > { %467 = vst.msk [vmem:[%s284_s14 + $0x4] sm:$0xf] %vm465_vm8, %v907_v27  ;;  %565 = vrot.lane.b32.xlu1 %v502_v30, %s1016_s15  ;;  %525 = vrot.lane.b32.xlu0 %v492_v31, %s1017_s16 }
  0xfc   : > { %534 = vrot.lane.b32.xlu1 %v449_v26, %s1018_s17  ;;  %527 = vrot.lane.b32.xlu0 %v493_v28, %s1017_s16  ;;  %s279_s16 = scalar_lea.vmem %s1155_s5, %s904_s13 }
  0xfe   : > { %v617_v32 = vld [vmem:[#allocation2 + $0x40] sm:$0xff]  ;;  %v618_v42 = vld [vmem:[#allocation2 + $0x48] sm:$0xff] }
  0xff   : > { %917 = vmatprep.subr.bf16.mxu1 %v617_v32 }
 0x100   : > { %536 = vrot.lane.b32.xlu1 %v450_v23, %s1018_s17  ;;  %567 = vrot.lane.b32.xlu0 %v503_v29, %s1016_s15 }
 0x104   : > { %545 = vrot.lane.b32.xlu1 %v502_v30, %s1019_s18  ;;  %574 = vrot.lane.b32.xlu0 %v492_v31, %s1020_s19 }
 0x108   : > { %547 = vrot.lane.b32.xlu1 %v503_v29, %s1019_s18  ;;  %576 = vrot.lane.b32.xlu0 %v493_v28, %s1020_s19 }
 0x10c   : > { %554 = vrot.lane.b32.xlu1 %v492_v31, %s1021_s20  ;;  %583 = vrot.lane.b32.xlu0 %v449_v26, %s1022_s23 }
 0x110   : > { %556 = vrot.lane.b32.xlu1 %v493_v28, %s1021_s20  ;;  %585 = vrot.lane.b32.xlu0 %v450_v23, %s1022_s23 }
 0x114   : > { %594 = vrot.lane.b32.xlu1 %v503_v29, %s1023_s26  ;;  %592 = vrot.lane.b32.xlu0 %v502_v30, %s1023_s26 }
 0x16a   : > { %v566_v35 = vpop.permute.xlu1 %565  ;;  %v526_v36 = vpop.permute.xlu0 %525 }
 0x16b   : > { %572 = vst.msk [vmem:[#allocation2 + $0x50] sm:$0xff] %vm571_vm11, %v566_v35 }
 0x16c   : > { %532 = vst.msk [vmem:[#allocation2] sm:$0xff] %vm531_vm12, %v526_v36 }
 0x16e   : > { %v535_v37 = vpop.permute.xlu1 %534  ;;  %v528_v38 = vpop.permute.xlu0 %527 }
 0x16f   : > { %541 = vst.msk [vmem:[#allocation2 + $0x10] sm:$0xff] %vm540_vm13, %v535_v37 }
 0x170   : > { %533 = vst.msk [vmem:[#allocation2 + $0x8] sm:$0xff] %vm531_vm12, %v528_v38 }
 0x172   : > { %v537_v39 = vpop.permute.xlu1 %536  ;;  %v568_v40 = vpop.permute.xlu0 %567  ;;  %v619_v46 = vld [vmem:[#allocation2 + $0x50] sm:$0xff] }
 0x173   : > { %v609_v41 = vld [vmem:[#allocation2] sm:$0xff]  ;;  %542 = vst.msk [vmem:[#allocation2 + $0x18] sm:$0xff] %vm540_vm13, %v537_v39 }
 0x174   : > { %573 = vst.msk [vmem:[#allocation2 + $0x58] sm:$0xff] %vm571_vm11, %v568_v40  ;;  %918 = vmatpush3.bf16.msra.mxu1 %v609_v41 }
 0x175   : > { %919 = vmatprep.subr.bf16.mxu1 %v618_v42 }
 0x176   : > { %v546_v43 = vpop.permute.xlu1 %545  ;;  %v575_v44 = vpop.permute.xlu0 %574  ;;  %v611_v49 = vld [vmem:[#allocation2 + $0x10] sm:$0xff] }
 0x177   : > { %v610_v45 = vld [vmem:[#allocation2 + $0x8] sm:$0xff]  ;;  %552 = vst.msk [vmem:[#allocation2 + $0x20] sm:$0xff] %vm551_vm14, %v546_v43 }
 0x178   : > { %581 = vst.msk [vmem:[#allocation2 + $0x60] sm:$0xff] %vm580_vm15, %v575_v44  ;;  %920 = vmatpush3.bf16.msra.mxu1 %v610_v45 }
 0x179   : > { %921 = vmatprep.subr.bf16.mxu1 %v619_v46 }
 0x17a   : > { %v548_v47 = vpop.permute.xlu1 %547  ;;  %v577_v48 = vpop.permute.xlu0 %576  ;;  %v612_v53 = vld [vmem:[#allocation2 + $0x18] sm:$0xff] }
 0x17b   : > { %v620_v50 = vld [vmem:[#allocation2 + $0x58] sm:$0xff]  ;;  %553 = vst.msk [vmem:[#allocation2 + $0x28] sm:$0xff] %vm551_vm14, %v548_v47 }
 0x17c   : > { %582 = vst.msk [vmem:[#allocation2 + $0x68] sm:$0xff] %vm580_vm15, %v577_v48  ;;  %922 = vmatpush3.bf16.msra.mxu1 %v611_v49 }
 0x17d   : > { %923 = vmatprep.subr.bf16.mxu1 %v620_v50 }
 0x17e   : > { %v555_v51 = vpop.permute.xlu1 %554  ;;  %v584_v52 = vpop.permute.xlu0 %583  ;;  %v613_v57 = vld [vmem:[#allocation2 + $0x20] sm:$0xff] }
 0x17f   : > { %v621_v54 = vld [vmem:[#allocation2 + $0x60] sm:$0xff]  ;;  %561 = vst.msk [vmem:[#allocation2 + $0x30] sm:$0xff] %vm560_vm0, %v555_v51 }
 0x180   : > { %590 = vst.msk [vmem:[#allocation2 + $0x70] sm:$0xff] %vm589_vm1, %v584_v52  ;;  %924 = vmatpush3.bf16.msra.mxu1 %v612_v53 }
 0x181   : > { %925 = vmatprep.subr.bf16.mxu1 %v621_v54 }
 0x182   : > { %v557_v55 = vpop.permute.xlu1 %556  ;;  %v586_v56 = vpop.permute.xlu0 %585  ;;  %v614_v61 = vld [vmem:[#allocation2 + $0x28] sm:$0xff] }
 0x183   : > { %v622_v58 = vld [vmem:[#allocation2 + $0x68] sm:$0xff]  ;;  %562 = vst.msk [vmem:[#allocation2 + $0x38] sm:$0xff] %vm560_vm0, %v557_v55 }
 0x184   : > { %591 = vst.msk [vmem:[#allocation2 + $0x78] sm:$0xff] %vm589_vm1, %v586_v56  ;;  %926 = vmatpush3.bf16.msra.mxu1 %v613_v57 }
 0x185   : > { %927 = vmatprep.subr.bf16.mxu1 %v622_v58 }
 0x186   : > { %v595_v59 = vpop.permute.xlu1 %594  ;;  %v593_v60 = vpop.permute.xlu0 %592  ;;  %v615_v63 = vld [vmem:[#allocation2 + $0x30] sm:$0xff] }
 0x187   : > { %v623_v62 = vld [vmem:[#allocation2 + $0x70] sm:$0xff]  ;;  %600 = vst.msk [vmem:[#allocation2 + $0x88] sm:$0xff] %vm598_vm4, %v595_v59  ;;  %599 = vst.msk [vmem:[#allocation2 + $0x80] sm:$0xff] %vm598_vm4, %v593_v60 }
 0x188   : > { %928 = vmatpush3.bf16.msra.mxu1 %v614_v61 }
 0x189   : > { %929 = vmatprep.subr.bf16.mxu1 %v623_v62 }
 0x18a   : > { %v616_v1 = vld [vmem:[#allocation2 + $0x38] sm:$0xff] }
 0x18b   : > { %v624_v0 = vld [vmem:[#allocation2 + $0x78] sm:$0xff] }
 0x18c   : > { %930 = vmatpush3.bf16.msra.mxu1 %v615_v63 }
 0x18d   : > { %931 = vmatprep.subr.bf16.mxu1 %v624_v0 }
 0x18e   : > { %v625_v2 = vld [vmem:[#allocation2 + $0x80] sm:$0xff]  ;;  %v626_v5 = vld [vmem:[#allocation2 + $0x88] sm:$0xff] }
 0x18f   : > { %963 = vmatprep.subr.bf16.mxu0 %v625_v2 }
 0x190   : > { %932 = vmatpush3.bf16.msra.mxu1 %v616_v1  ;;  %964 = vmatpush3.bf16.msra.mxu0 %v625_v2 }
 0x191   : > { %965 = vmatprep.subr.bf16.mxu0 %v626_v5 }
 0x193   : > { %696 = vmatmul.mubr.bf16.vlgmr.msra.gmra.mrb[0].mxu1 %v999_v3 }
 0x194   : > { %703 = vmatprep.mubr.bf16.mxu1 %v1004_v4  ;;  %966 = vmatpush3.bf16.msra.mxu0 %v626_v5 }
 0x197   : > { %968 = vmatmul.mubr.msk.bf16.vlgmr.msra.gmra.mrb[4].mxu0 %vm393_vm2, %v1003_v6 }
 0x19b   : > { %704 = vmatmul.mubr.bf16.gmra.mrb[4].mxu1 %v1006_v7 }
 0x266   : > { %v933_v8 = vpop.f32.mrb[0].mxu1 }
 0x267   : > { %v934_v9 = vpop.f32.mrb[1].mxu1 }
 0x268   : > { %v935_v10 = vadd.f32 %v934_v9, %v933_v8  ;;  %v936_v11 = vpop.f32.mrb[2].mxu1 }
 0x269   : > { %v937_v12 = vpop.f32.mrb[3].mxu1 }
 0x26a   : > { %v938_v13 = vadd.f32 %v937_v12, %v936_v11  ;;  %v969_v14 = vpop.f32.mrb[4].mxu0 }
 0x26b   : > { %v746_v15 = vpop.f32.mrb[5].mxu0 }
 0x26c   : > { %v747_v16 = vadd.f32 %v935_v10, %v746_v15  ;;  %v970_v17 = vpop.f32.mrb[6].mxu0 }
 0x26d   : > { %v749_v19 = vpop.f32.mrb[7].mxu0 }
 0x26e   : > { %v939_v18 = vpop.f32.mrb[4].mxu1  ;;  %761 = vst.msk [vmem:[%s279_s16] sm:$0xff] %vm504_vm3, %v747_v16  ;;  %v750_v20 = vadd.f32 %v938_v13, %v749_v19 }
 0x26f   : > { %v940_v21 = vpop.f32.mrb[5].mxu1 }
 0x270   : > { %v941_v22 = vadd.f32 %v940_v21, %v939_v18  ;;  %v942_v23 = vpop.f32.mrb[6].mxu1  ;;  %762 = vst.msk [vmem:[%s279_s16 + $0x8] sm:$0xff] %vm504_vm3, %v750_v20 }
 0x271   : > { %v943_v24 = vpop.f32.mrb[7].mxu1 }
 0x272   : > { %v755_v25 = vadd.f32 %v969_v14, %v941_v22  ;;  %v944_v26 = vadd.f32 %v943_v24, %v942_v23 }
 0x274   : > { %763 = vst.msk [vmem:[%s279_s16 + $0x10] sm:$0xff] %vm504_vm3, %v755_v25  ;;  %v758_v27 = vadd.f32 %v970_v17, %v944_v26 }
 0x276   : > { %764 = vst.msk [vmem:[%s279_s16 + $0x18] sm:$0xff] %vm504_vm3, %v758_v27 }
 0x277 PF: > { %s17_s21 = sadd.s32 1, %s1013_s21  }
 0x278   : > { %p14_p4 = scmp.ge.s32.totalorder %s17_s21, 4  }
 0x27a   :  { %16 = sbr.rel (!%p14_p4) target bundleno = 1 (0x1), region = 85 }

// kernel: fpn_forward.7
= control target key start
LH: loop header
LB: loop body
LE: loop exit
PB: predicated region body
PF: predicated region fallthrough
CT: control target
= control target key end

     0   :  { %s1147_s18 = smov 0   ;;  %s1308_s0 = inlined_call_operand.vmem [shape: bf16[2,8,256], index: 0, kind: input, shape index: {}]   ;;  %s1309_s1 = inlined_call_operand.vmem [shape: bf16[2,32,64], index: 1, kind: input, shape index: {}]   ;;  %s1310_s2 = inlined_call_operand.vmem [shape: bf16[64,256], index: 2, kind: input, shape index: {}]   ;;  %s1311_s3 = inlined_call_operand.vmem [shape: bf16[32,8], index: 3, kind: input, shape index: {}]   ;;  %s1312_s4 = inlined_call_operand.vmem [shape: bf16[32,288], index: 4, kind: input, shape index: {}]   ;;  %s1313_s5 = inlined_call_operand.vmem [shape: f32[2,32,256], index: 5, kind: output, shape index: {}]  }
   0x1 LB: > { %s998_s19 = sadd.s32 4294967295, %s1106_s18   ;;  %p1002_p0 = scmp.ge.s32.totalorder %s1106_s18, 1  ;;  %s1106_s18 = sphi %s1147_s18, %s15_s18  }
   0x2   : > { %p197_p1 = scmp.lt.s32.totalorder %s1106_s18, 3 }
   0x4   : > { %p198_p2 = pnand %p1002_p0, %p197_p1 }
   0x5   : > { %v1074_v0 = vld [vmem:[%s1310_s2 + $0x4] ss:$8 sps:$4 sm:$0xff] (!%p198_p2)   ;;  %p1158_p3 = scmp.lt.s32.totalorder (!%p198_p2), %s998_s19, 1  ;;  %v1076_v1 = vld [vmem:[%s1310_s2] ss:$8 sps:$4 sm:$0xff] (!%p198_p2)   ;;  %v1108_v2 = vmov (!%p198_p2), 0   ;;  %v461_v17 = vlaneseq (!%p198_p2) }
   0x6   : > { %201 = sbr.rel (%p198_p2) target bundleno = 676 (0x2a4), region = 40  ;;  %354 = vmatprep.mubr.bf16.mxu0 (!%p198_p2), %v1108_v2  ;;  %524 = vst [vmem:[#allocation2] sm:$0xff] (!%p198_p2), %v1108_v2  ;;  %526 = vst [vmem:[#allocation2 + $0x10] sm:$0xff] (!%p198_p2), %v1108_v2  ;;  %322 = vmatprep.subr.bf16.mxu0 (!%p198_p2), %v1074_v0  ;;  %v1077_v3 = vld [vmem:[%s1310_s2 + $0x14] ss:$8 sps:$4 sm:$0xff] (!%p198_p2)   ;;  %vm397_vm0 = vcmask (!%p198_p2), 1043456  }
   0x7   : > { %528 = vst [vmem:[#allocation2 + $0x20] sm:$0xff] (!%p198_p2), %v1108_v2  ;;  %530 = vst [vmem:[#allocation2 + $0x30] sm:$0xff] (!%p198_p2), %v1108_v2  ;;  %323 = vmatpush1.bf16.msra.mxu0 (!%p198_p2), %v1076_v1  ;;  %v1079_v4 = vld [vmem:[%s1310_s2 + $0x10] ss:$8 sps:$4 sm:$0xff] (!%p198_p2)   ;;  %v1080_v5 = vld [vmem:[%s1310_s2 + $0x24] ss:$8 sps:$4 sm:$0xff] (!%p198_p2)  }
   0x8   : > { %532 = vst [vmem:[#allocation2 + $0x40] sm:$0xff] (!%p198_p2), %v1108_v2  ;;  %534 = vst [vmem:[#allocation2 + $0x50] sm:$0xff] (!%p198_p2), %v1108_v2  ;;  %324 = vmatprep.subr.bf16.mxu0 (!%p198_p2), %v1077_v3  ;;  %v1082_v6 = vld [vmem:[%s1310_s2 + $0x20] ss:$8 sps:$4 sm:$0xff] (!%p198_p2)   ;;  %v1083_v7 = vld [vmem:[%s1310_s2 + $0x34] ss:$8 sps:$4 sm:$0xff] (!%p198_p2)  }
   0x9   : > { %536 = vst [vmem:[#allocation2 + $0x60] sm:$0xff] (!%p198_p2), %v1108_v2  ;;  %538 = vst [vmem:[#allocation2 + $0x70] sm:$0xff] (!%p198_p2), %v1108_v2  ;;  %v1085_v8 = vld [vmem:[%s1310_s2 + $0x30] ss:$8 sps:$4 sm:$0xff] (!%p198_p2)   ;;  %vm315_vm1 = vcmask (!%p198_p2), 523264   ;;  %v1090_v15 = vld [vmem:[%s1311_s3] sm:$0xff] (!%p198_p2)  }
   0xa   : > { %545 = vst [vmem:[#allocation2 + $0xa8] sm:$0xff] (!%p198_p2), %v1108_v2  ;;  %547 = vst [vmem:[#allocation2 + $0xb8] sm:$0xff] (!%p198_p2), %v1108_v2  ;;  %vm390_vm2 = vcmask (!%p198_p2), 64512   ;;  %v1091_v16 = vld [vmem:[%s1311_s3 + $0x8] sm:$0xff] (!%p198_p2)   ;;  %v462_v18 = vand.u32 (!%p198_p2), 127, %v461_v17  ;;  %v493_v22 = vshrl.u32 (!%p198_p2), %v461_v17, 7 }
   0xb   : > { %549 = vst [vmem:[#allocation2 + $0xc8] sm:$0xff] (!%p198_p2), %v1108_v2  ;;  %551 = vst [vmem:[#allocation2 + $0xd8] sm:$0xff] (!%p198_p2), %v1108_v2  ;;  %325 = vmatpush1.bf16.msra.mxu0 (!%p198_p2), %v1079_v4  ;;  %s1109_s26 = smov (!%p198_p2), 17   ;;  %s1110_s27 = smov (!%p198_p2), 16   ;;  %v1094_v51 = vld [vmem:[%s1312_s4 + $0x4] ss:$12 sps:$4 sm:$0xff] (!%p198_p2)  }
   0xc   : > { %553 = vst [vmem:[#allocation2 + $0xe8] sm:$0xff] (!%p198_p2), %v1108_v2  ;;  %555 = vst [vmem:[#allocation2 + $0xf8] sm:$0xff] (!%p198_p2), %v1108_v2  ;;  %326 = vmatprep.subr.bf16.mxu0 (!%p198_p2), %v1080_v5  ;;  %v463_v19 = vadd.s32 (!%p198_p2), 128, %v462_v18  ;;  %v468_v20 = vand.u32 (!%p198_p2), 15, %v462_v18  ;;  %v494_v23 = vsub.s32 (!%p198_p2), 0, %v493_v22  ;;  %v498_v26 = vsub.s32 (!%p198_p2), 4, %v493_v22  ;;  %849 = vmatprep.mubr.bf16.mxu1 (!%p198_p2), %v1094_v51 }
   0xd   : > { %557 = vst [vmem:[#allocation2 + $0x108] sm:$0xff] %v1108_v2  ;;  %559 = vst [vmem:[#allocation2 + $0x118] sm:$0xff] %v1108_v2  ;;  %s1316_s19 = smov (!%p1158_p3, %s998_s19), 1  ;;  %s1111_s28 = smov 15   ;;  %vm579_vm13 = vcmask 1047688   ;;  %vm572_vm14 = vcmask 138240  }
   0xe   : > { %s1039_s6 = sshll.u32 %s1316_s19, 4  ;;  %s1038_s7 = sshll.u32 %s1316_s19, 3  ;;  %v475_v21 = vand.u32 15, %v463_v19  ;;  %vm488_vm3 = vcmp.eq.s32.totalorder %v468_v20, 15  ;;  %vm506_vm7 = vcmp.eq.s32.totalorder %v468_v20, 0  ;;  %vm603_vm15 = vcmask 1047680  }
   0xf   : > { %s239_s10 = scalar_lea.vmem %s1309_s1, %s1039_s6  ;;  %s234_s13 = scalar_lea.vmem %s1308_s0, %s1038_s7  ;;  %327 = vmatpush1.bf16.msra.mxu0 %v1082_v6 }
  0x10   : > { %v252_v9 = vld [vmem:[%s234_s13] sm:$0xff]  ;;  %328 = vmatprep.subr.bf16.mxu0 %v1083_v7  ;;  %v1089_v14 = vld [vmem:[%s239_s10 + $0x8] sm:$0xff]   ;;  %vm489_vm4 = vcmp.eq.s32.totalorder %v475_v21, 15  ;;  %vm507_vm8 = vcmp.eq.s32.totalorder %v475_v21, 0  ;;  %s1112_s29 = smov 1   ;;  %s1113_s30 = smov 127  }
  0x11   : > { %v1024_v10 = vcombine.high %v252_v9, %v252_v9  ;;  %v1023_v11 = vcombine.low %v252_v9, %v252_v9  ;;  %v1086_v12 = vld [vmem:[%s239_s10] sm:$0xff]   ;;  %vm490_vm5 = vmpackc.low %vm489_vm4, %vm488_vm3  ;;  %s1114_s6 = smov 113   ;;  %s1115_s7 = smov 112   ;;  %vm620_vm3 = vcmask 121856   ;;  %vm640_vm4 = vcmask 7168  }
  0x12   : > { %v491_v24 = vsel %vm490_vm5, 65537, %v1108_v2  ;;  %vm508_vm10 = vmpackc.low %vm507_vm8, %vm506_vm7  ;;  %s1116_s8 = smov 111   ;;  %vm664_vm5 = vcmask 1039360   ;;  %vm704_vm7 = vcmask 916480   ;;  %vm724_vm8 = vcmask 908288   ;;  %s1040_s23 = sshll.u32 %s1316_s19, 6 }
  0x13   : > { %329 = vmatpush1.bf16.msra.mxu0 %v1085_v8  ;;  %v399_v13 = vsel %vm397_vm0, %v1023_v11, 0  ;;  %v495_v25 = vrot.slane %v491_v24, %v494_v23  ;;  %v499_v30 = vrot.slane %v491_v24, %v498_v26  ;;  %v509_v41 = vsel %vm508_vm10, 65537, %v1108_v2 }
  0x14   : > { %1025 = vmatprep.subr.msk.bf16.mxu0 %vm397_vm0, %v1024_v10  ;;  %v513_v44 = vrot.slane %v509_v41, %v494_v23  ;;  %v517_v47 = vrot.slane %v509_v41, %v498_v26  ;;  %vm627_vm0 = vcmask 1047672  }
  0x15   : > { %vm500_vm6 = vcmp.ne.s16.totalorder %v495_v25, 0  ;;  %vm501_vm9 = vcmp.ne.s16.totalorder %v499_v30, 0 }
  0x16   : > { %1019 = vmatmul.mubr.msk.bf16.vlgmr.msra.gmra.mrb[0].mxu0 %vm315_vm1, %v1086_v12  ;;  %vm518_vm11 = vcmp.ne.s16.totalorder %v513_v44, 0  ;;  %vm519_vm12 = vcmp.ne.s16.totalorder %v517_v47, 0 }
  0x17   : > { %405 = vmatpush1.bf16.msra.mxu0 %v399_v13  ;;  %364 = vmatprep.mubr.bf16.mxu0 %v1108_v2 }
  0x1e   : > { %1020 = vmatmul.mubr.msk.bf16.gmra.mrb[4].mxu0 %vm315_vm1, %v1089_v14  ;;  %vm596_vm1 = vcmask 130048  }
  0x1f   : > { %436 = vmatprep.mubr.bf16.mxu0 %v1108_v2 }
  0x26   : > { %1026 = vmatmul.mubr.msk.bf16.vlgmr.msra.gmra.mrb[0].mxu0 %vm390_vm2, %v1090_v15 }
  0x27   : > { %446 = vmatprep.mubr.bf16.mxu0 %v1108_v2 }
  0x2e   : > { %1027 = vmatmul.mubr.msk.bf16.gmra.mrb[4].mxu0 %vm390_vm2, %v1091_v16  ;;  %vm647_vm2 = vcmask 1047560  }
  0x2f   : > { %902 = vmatprep.mubr.bf16.mxu0 %v1108_v2 }
  0xf9   : > { %v438_v27 = vpop.f32.mrb[0].mxu0 }
  0xfa   : > { %v440_v28 = vpop.f32.mrb[1].mxu0 }
  0xfb   : > { %v442_v29 = vpop.f32.mrb[2].mxu0 }
  0xfc   : > { %v1223_v31 = vpack.c.bf16 %v442_v29, %v438_v27  ;;  %v444_v32 = vpop.f32.mrb[3].mxu0 }
  0xfd   : > { %v1225_v33 = vpack.c.bf16 %v444_v32, %v440_v28 }
  0xfe   : > { %v502_v34 = vsel %vm500_vm6, 0, %v1223_v31  ;;  %v520_v46 = vsel %vm518_vm11, 0, %v1223_v31 }
  0xff   : > { %564 = vrot.lane.b32.xlu0 %v502_v34, %s1109_s26  ;;  %v503_v37 = vsel %vm501_vm9, 0, %v1225_v33  ;;  %v521_v49 = vsel %vm519_vm12, 0, %v1225_v33 }
 0x101   : > { %v448_v35 = vpop.f32.mrb[4].mxu0 }
 0x102   : > { %v450_v36 = vpop.f32.mrb[5].mxu0 }
 0x103   : > { %566 = vrot.lane.b32.xlu0 %v503_v37, %s1109_s26  ;;  %v452_v38 = vpop.f32.mrb[6].mxu0 }
 0x104   : > { %v1231_v39 = vpack.c.bf16 %v452_v38, %v448_v35  ;;  %v454_v40 = vpop.f32.mrb[7].mxu0 }
 0x105   : > { %v1234_v42 = vpack.c.bf16 %v454_v40, %v450_v36 }
 0x106   : > { %v504_v43 = vsel %vm500_vm6, 0, %v1231_v39  ;;  %v522_v48 = vsel %vm518_vm11, 0, %v1231_v39  ;;  %vm684_vm6 = vcmask 924672  }
 0x107   : > { %588 = vrot.lane.b32.xlu0 %v1223_v31, %s1110_s27  ;;  %568 = vrot.lane.b32.xlu1 %v504_v43, %s1109_s26  ;;  %v505_v45 = vsel %vm501_vm9, 0, %v1234_v42  ;;  %v523_v50 = vsel %vm519_vm12, 0, %v1234_v42  ;;  %vm810_vm9 = vcmask 261120  }
 0x10b   : > { %592 = vrot.lane.b32.xlu0 %v1231_v39, %s1110_s27  ;;  %570 = vrot.lane.b32.xlu1 %v505_v45, %s1109_s26  ;;  %s1295_s26 = scalar_lea.vmem %s1313_s5, %s1040_s23 }
 0x10f   : > { %612 = vrot.lane.b32.xlu0 %v520_v46, %s1111_s28  ;;  %590 = vrot.lane.b32.xlu1 %v1225_v33, %s1110_s27 }
 0x113   : > { %616 = vrot.lane.b32.xlu0 %v522_v48, %s1111_s28  ;;  %594 = vrot.lane.b32.xlu1 %v1234_v42, %s1110_s27 }
 0x117   : > { %632 = vrot.lane.b32.xlu0 %v502_v34, %s1112_s29  ;;  %614 = vrot.lane.b32.xlu1 %v521_v49, %s1111_s28 }
 0x11b   : > { %636 = vrot.lane.b32.xlu0 %v504_v43, %s1112_s29  ;;  %618 = vrot.lane.b32.xlu1 %v523_v50, %s1111_s28 }
 0x11f   : > { %656 = vrot.lane.b32.xlu0 %v520_v46, %s1113_s30  ;;  %634 = vrot.lane.b32.xlu1 %v503_v37, %s1112_s29 }
 0x123   : > { %660 = vrot.lane.b32.xlu0 %v522_v48, %s1113_s30  ;;  %638 = vrot.lane.b32.xlu1 %v505_v45, %s1112_s29 }
 0x127   : > { %676 = vrot.lane.b32.xlu0 %v502_v34, %s1114_s6  ;;  %658 = vrot.lane.b32.xlu1 %v521_v49, %s1113_s30 }
 0x12b   : > { %680 = vrot.lane.b32.xlu0 %v504_v43, %s1114_s6  ;;  %678 = vrot.lane.b32.xlu1 %v503_v37, %s1114_s6 }
 0x12f   : > { %696 = vrot.lane.b32.xlu0 %v1223_v31, %s1115_s7  ;;  %698 = vrot.lane.b32.xlu1 %v1225_v33, %s1115_s7 }
 0x133   : > { %716 = vrot.lane.b32.xlu0 %v520_v46, %s1116_s8  ;;  %662 = vrot.lane.b32.xlu1 %v523_v50, %s1113_s30 }
 0x137   : > { %700 = vrot.lane.b32.xlu0 %v1231_v39, %s1115_s7  ;;  %718 = vrot.lane.b32.xlu1 %v521_v49, %s1116_s8 }
 0x13b   : > { %720 = vrot.lane.b32.xlu0 %v522_v48, %s1116_s8  ;;  %682 = vrot.lane.b32.xlu1 %v505_v45, %s1114_s6 }
 0x13f   : > { %702 = vrot.lane.b32.xlu1 %v1234_v42, %s1115_s7 }
 0x143   : > { %722 = vrot.lane.b32.xlu1 %v523_v50, %s1116_s8 }
 0x171   : > { %v565_v52 = vpop.permute.xlu0 %564 }
 0x172   : > { %580 = vst.msk [vmem:[#allocation2] sm:$0xff] %vm579_vm13, %v565_v52 }
 0x175   : > { %v567_v53 = vpop.permute.xlu0 %566 }
 0x176   : > { %v573_v54 = vsel %vm572_vm14, %v565_v52, %v567_v53  ;;  %v1092_v53 = vld [vmem:[%s1312_s4] ss:$12 sps:$4 sm:$0xff]  }
 0x177   : > { %817 = vmatprep.subr.bf16.mxu1 %v573_v54  ;;  %v1095_v54 = vld [vmem:[%s1312_s4 + $0x8] ss:$12 sps:$4 sm:$0xff]  }
 0x179   : > { %v589_v55 = vpop.permute.xlu0 %588  ;;  %v569_v56 = vpop.permute.xlu1 %568  ;;  %v744_v57 = vld [vmem:[#allocation2] sm:$0xff] }
 0x17a   : > { %604 = vst.msk [vmem:[#allocation2 + $0x20] sm:$0xff] %vm603_vm15, %v589_v55  ;;  %818 = vmatpush1.bf16.msra.mxu1 %v744_v57  ;;  %v1099_v57 = vld [vmem:[%s1312_s4 + $0x20] ss:$12 sps:$4 sm:$0xff]  }
 0x17b   : > { %582 = vst.msk [vmem:[#allocation2 + $0x10] sm:$0xff] %vm579_vm13, %v569_v56 }
 0x17d   : > { %v593_v58 = vpop.permute.xlu0 %592  ;;  %v571_v59 = vpop.permute.xlu1 %570 }
 0x17e   : > { %606 = vst.msk [vmem:[#allocation2 + $0x30] sm:$0xff] %vm603_vm15, %v593_v58  ;;  %v574_v60 = vsel %vm572_vm14, %v569_v56, %v571_v59  ;;  %v1098_v56 = vld [vmem:[%s1312_s4 + $0x18] ss:$12 sps:$4 sm:$0xff]  }
 0x17f   : > { %819 = vmatprep.subr.bf16.mxu1 %v574_v60 }
 0x181   : > { %v613_v61 = vpop.permute.xlu0 %612  ;;  %v591_v62 = vpop.permute.xlu1 %590  ;;  %v748_v4 = vld [vmem:[#allocation2 + $0x20] sm:$0xff] }
 0x182   : > { %v746_v63 = vld [vmem:[#allocation2 + $0x10] sm:$0xff]  ;;  %628 = vst.msk [vmem:[#allocation2 + $0x40] sm:$0xff] %vm627_vm0, %v613_v61  ;;  %v597_v0 = vsel %vm596_vm1, %v589_v55, %v591_v62  ;;  %v1096_v55 = vld [vmem:[%s1312_s4 + $0x1c] ss:$12 sps:$4 sm:$0xff]  }
 0x183   : > { %820 = vmatpush1.bf16.msra.mxu1 %v746_v63 }
 0x184   : > { %821 = vmatprep.subr.bf16.mxu1 %v597_v0 }
 0x185   : > { %v617_v1 = vpop.permute.xlu0 %616  ;;  %v595_v3 = vpop.permute.xlu1 %594  ;;  %v750_v8 = vld [vmem:[#allocation2 + $0x30] sm:$0xff] }
 0x186   : > { %630 = vst.msk [vmem:[#allocation2 + $0x50] sm:$0xff] %vm627_vm0, %v617_v1  ;;  %v598_v5 = vsel %vm596_vm1, %v593_v58, %v595_v3 }
 0x187   : > { %822 = vmatpush1.bf16.msra.mxu1 %v748_v4 }
 0x188   : > { %823 = vmatprep.subr.bf16.mxu1 %v598_v5 }
 0x189   : > { %v633_v6 = vpop.permute.xlu0 %632  ;;  %v615_v7 = vpop.permute.xlu1 %614  ;;  %v752_v12 = vld [vmem:[#allocation2 + $0x40] sm:$0xff] }
 0x18a   : > { %648 = vst.msk [vmem:[#allocation2 + $0x60] sm:$0xff] %vm647_vm2, %v633_v6  ;;  %v621_v9 = vsel %vm620_vm3, %v613_v61, %v615_v7 }
 0x18b   : > { %824 = vmatpush1.bf16.msra.mxu1 %v750_v8 }
 0x18c   : > { %825 = vmatprep.subr.bf16.mxu1 %v621_v9 }
 0x18d   : > { %v637_v10 = vpop.permute.xlu0 %636  ;;  %v619_v11 = vpop.permute.xlu1 %618  ;;  %v754_v16 = vld [vmem:[#allocation2 + $0x50] sm:$0xff] }
 0x18e   : > { %650 = vst.msk [vmem:[#allocation2 + $0x70] sm:$0xff] %vm647_vm2, %v637_v10  ;;  %v622_v13 = vsel %vm620_vm3, %v617_v1, %v619_v11 }
 0x18f   : > { %826 = vmatpush1.bf16.msra.mxu1 %v752_v12 }
 0x190   : > { %827 = vmatprep.subr.bf16.mxu1 %v622_v13 }
 0x191   : > { %v657_v14 = vpop.permute.xlu0 %656  ;;  %v635_v15 = vpop.permute.xlu1 %634  ;;  %v756_v20 = vld [vmem:[#allocation2 + $0x60] sm:$0xff] }
 0x192   : > { %v641_v17 = vsel %vm640_vm4, %v633_v6, %v635_v15 }
 0x193   : > { %828 = vmatpush1.bf16.msra.mxu1 %v754_v16 }
 0x194   : > { %829 = vmatprep.subr.bf16.mxu1 %v641_v17 }
 0x195   : > { %v661_v18 = vpop.permute.xlu0 %660  ;;  %v639_v19 = vpop.permute.xlu1 %638  ;;  %v758_v24 = vld [vmem:[#allocation2 + $0x70] sm:$0xff] }
 0x196   : > { %v642_v21 = vsel %vm640_vm4, %v637_v10, %v639_v19 }
 0x197   : > { %830 = vmatpush1.bf16.msra.mxu1 %v756_v20 }
 0x198   : > { %831 = vmatprep.subr.bf16.mxu1 %v642_v21 }
 0x199   : > { %v677_v22 = vpop.permute.xlu0 %676  ;;  %v659_v23 = vpop.permute.xlu1 %658 }
 0x19a   : > { %v665_v25 = vsel %vm664_vm5, %v657_v14, %v659_v23  ;;  %673 = vst.msk [vmem:[#allocation2 + $0xa8] sm:$0xff] %vm664_vm5, %v659_v23 }
 0x19b   : > { %832 = vmatpush1.bf16.msra.mxu1 %v758_v24 }
 0x19c   : > { %833 = vmatprep.subr.bf16.mxu1 %v1225_v33 }
 0x19d   : > { %v681_v26 = vpop.permute.xlu0 %680  ;;  %v679_v27 = vpop.permute.xlu1 %678 }
 0x19e   : > { %v685_v28 = vsel %vm684_vm6, %v677_v22, %v679_v27  ;;  %693 = vst.msk [vmem:[#allocation2 + $0xc8] sm:$0xff] %vm684_vm6, %v679_v27 }
 0x19f   : > { %834 = vmatpush1.bf16.msra.mxu1 %v1223_v31 }
 0x1a0   : > { %835 = vmatprep.subr.bf16.mxu1 %v1234_v42 }
 0x1a1   : > { %v697_v29 = vpop.permute.xlu0 %696  ;;  %v699_v30 = vpop.permute.xlu1 %698  ;;  %v765_v32 = vld [vmem:[#allocation2 + $0xa8] sm:$0xff] }
 0x1a2   : > { %v705_v34 = vsel %vm704_vm7, %v697_v29, %v699_v30  ;;  %713 = vst.msk [vmem:[#allocation2 + $0xe8] sm:$0xff] %vm704_vm7, %v699_v30 }
 0x1a3   : > { %836 = vmatpush1.bf16.msra.mxu1 %v1231_v39 }
 0x1a4   : > { %837 = vmatprep.subr.bf16.mxu1 %v765_v32 }
 0x1a5   : > { %v663_v33 = vpop.permute.xlu1 %662  ;;  %v717_v31 = vpop.permute.xlu0 %716  ;;  %v769_v42 = vld [vmem:[#allocation2 + $0xc8] sm:$0xff] }
 0x1a6   : > { %v666_v35 = vsel %vm664_vm5, %v661_v18, %v663_v33  ;;  %675 = vst.msk [vmem:[#allocation2 + $0xb8] sm:$0xff] %vm664_vm5, %v663_v33 }
 0x1a7   : > { %838 = vmatpush1.bf16.msra.mxu1 %v665_v25 }
 0x1a9   : > { %v719_v36 = vpop.permute.xlu1 %718  ;;  %v701_v39 = vpop.permute.xlu0 %700  ;;  %v773_v50 = vld [vmem:[#allocation2 + $0xe8] sm:$0xff] }
 0x1aa   : > { %v725_v37 = vsel %vm724_vm8, %v717_v31, %v719_v36  ;;  %733 = vst.msk [vmem:[#allocation2 + $0x108] sm:$0xff] %vm724_vm8, %v719_v36 }
 0x1ad   : > { %v683_v38 = vpop.permute.xlu1 %682  ;;  %v767_v40 = vld [vmem:[#allocation2 + $0xb8] sm:$0xff]  ;;  %v721_v46 = vpop.permute.xlu0 %720 }
 0x1ae   : > { %v686_v41 = vsel %vm684_vm6, %v681_v26, %v683_v38  ;;  %695 = vst.msk [vmem:[#allocation2 + $0xd8] sm:$0xff] %vm684_vm6, %v683_v38  ;;  %839 = vmatprep.subr.bf16.mxu1 %v767_v40 }
 0x1af   : > { %840 = vmatpush1.bf16.msra.mxu1 %v666_v35 }
 0x1b0   : > { %841 = vmatprep.subr.bf16.mxu1 %v769_v42 }
 0x1b1   : > { %v703_v43 = vpop.permute.xlu1 %702  ;;  %v777_v44 = vld [vmem:[#allocation2 + $0x108] sm:$0xff] }
 0x1b2   : > { %v706_v45 = vsel %vm704_vm7, %v701_v39, %v703_v43  ;;  %715 = vst.msk [vmem:[#allocation2 + $0xf8] sm:$0xff] %vm704_vm7, %v703_v43  ;;  %870 = vmatprep.subr.bf16.mxu0 %v777_v44 }
 0x1b3   : > { %871 = vmatpush1.bf16.msra.mxu0 %v725_v37  ;;  %842 = vmatpush1.bf16.msra.mxu1 %v685_v28 }
 0x1b5   : > { %v723_v47 = vpop.permute.xlu1 %722  ;;  %v771_v48 = vld [vmem:[#allocation2 + $0xd8] sm:$0xff] }
 0x1b6   : > { %v726_v49 = vsel %vm724_vm8, %v721_v46, %v723_v47  ;;  %735 = vst.msk [vmem:[#allocation2 + $0x118] sm:$0xff] %vm724_vm8, %v723_v47  ;;  %843 = vmatprep.subr.bf16.mxu1 %v771_v48 }
 0x1b7   : > { %844 = vmatpush1.bf16.msra.mxu1 %v686_v41 }
 0x1b8   : > { %845 = vmatprep.subr.bf16.mxu1 %v773_v50 }
 0x1b9   : > { %v775_v51 = vld [vmem:[#allocation2 + $0xf8] sm:$0xff] }
 0x1bb   : > { %846 = vmatpush1.bf16.msra.mxu1 %v705_v34 }
 0x1bc   : > { %847 = vmatprep.subr.bf16.mxu1 %v775_v51 }
 0x1bd   : > { %v779_v52 = vld [vmem:[#allocation2 + $0x118] sm:$0xff] }
 0x1be   : > { %872 = vmatprep.subr.bf16.mxu0 %v779_v52 }
 0x1bf   : > { %873 = vmatpush1.bf16.msra.mxu0 %v726_v49  ;;  %848 = vmatpush1.bf16.msra.mxu1 %v706_v45 }
 0x1c2   : > { %850 = vmatmul.mubr.bf16.vlgmr.msra.gmra.mrb[0].mxu1 %v1092_v53  ;;  %1034 = vmatmul.mubr.msk.bf16.vlgmr.msra.gmra.mrb[8].mxu0 %vm810_vm9, %v1095_v54 }
 0x1c3   : > { %859 = vmatprep.mubr.bf16.mxu1 %v1096_v55  ;;  %912 = vmatprep.mubr.bf16.mxu0 %v1108_v2 }
 0x1ca   : > { %860 = vmatmul.mubr.bf16.gmra.mrb[4].mxu1 %v1098_v56  ;;  %1035 = vmatmul.mubr.msk.bf16.gmra.mrb[12].mxu0 %vm810_vm9, %v1099_v57 }
 0x295   : > { %v851_v58 = vpop.f32.mrb[0].mxu1  ;;  %v904_v2 = vpop.f32.mrb[8].mxu0 }
 0x296   : > { %v905_v59 = vadd.f32 %v904_v2, %v851_v58  ;;  %v853_v60 = vpop.f32.mrb[1].mxu1  ;;  %v906_v61 = vpop.f32.mrb[9].mxu0 }
 0x297   : > { %v907_v62 = vadd.f32 %v906_v61, %v853_v60  ;;  %v855_v63 = vpop.f32.mrb[2].mxu1  ;;  %v908_v0 = vpop.f32.mrb[10].mxu0 }
 0x298   : > { %923 = vst [vmem:[%s1295_s26] sm:$0xff] %v905_v59  ;;  %v909_v1 = vadd.f32 %v908_v0, %v855_v63  ;;  %v857_v3 = vpop.f32.mrb[3].mxu1  ;;  %v910_v4 = vpop.f32.mrb[11].mxu0 }
 0x299   : > { %924 = vst [vmem:[%s1295_s26 + $0x8] sm:$0xff] %v907_v62  ;;  %v911_v5 = vadd.f32 %v910_v4, %v857_v3 }
 0x29a   : > { %925 = vst [vmem:[%s1295_s26 + $0x10] sm:$0xff] %v909_v1 }
 0x29b   : > { %926 = vst [vmem:[%s1295_s26 + $0x18] sm:$0xff] %v911_v5 }
 0x29d   : > { %v861_v6 = vpop.f32.mrb[4].mxu1  ;;  %v914_v7 = vpop.f32.mrb[12].mxu0 }
 0x29e   : > { %v915_v8 = vadd.f32 %v914_v7, %v861_v6  ;;  %v863_v9 = vpop.f32.mrb[5].mxu1  ;;  %v916_v10 = vpop.f32.mrb[13].mxu0 }
 0x29f   : > { %v917_v11 = vadd.f32 %v916_v10, %v863_v9  ;;  %v865_v12 = vpop.f32.mrb[6].mxu1  ;;  %v918_v13 = vpop.f32.mrb[14].mxu0 }
 0x2a0   : > { %927 = vst [vmem:[%s1295_s26 + $0x20] sm:$0xff] %v915_v8  ;;  %v919_v14 = vadd.f32 %v918_v13, %v865_v12  ;;  %v867_v15 = vpop.f32.mrb[7].mxu1  ;;  %v920_v16 = vpop.f32.mrb[15].mxu0 }
 0x2a1   : > { %928 = vst [vmem:[%s1295_s26 + $0x28] sm:$0xff] %v917_v11  ;;  %v921_v17 = vadd.f32 %v920_v16, %v867_v15 }
 0x2a2   : > { %929 = vst [vmem:[%s1295_s26 + $0x30] sm:$0xff] %v919_v14 }
 0x2a3   : > { %930 = vst [vmem:[%s1295_s26 + $0x38] sm:$0xff] %v921_v17 }
 0x2a4 PF: > { %s15_s18 = sadd.s32 1, %s1106_s18  }
 0x2a5   : > { %p12_p4 = scmp.ge.s32.totalorder %s15_s18, 4  }
 0x2a7   :  { %14 = sbr.rel (!%p12_p4) target bundleno = 1 (0x1), region = 73 }

</bundles_post_ra>
